<compile_context>
chip_gen: v7x
topology: tpu7x:2x2x1
jax: 0.10.0
libtpu: 0.0.40
codegen_flags: <defaults>
</compile_context>

<pallas_src>
import functools

import jax
import jax.numpy as jnp
from jax.experimental import pallas as pl
from jax.experimental.pallas import tpu as pltpu


def _scatter_kernel(start_ref, nchunk_ref, idx_ref, pf_ref, out_ref, *acc,
                    tile_n, kc):
    # start_ref, nchunk_ref : SMEM (n_tiles,) int32 scalar-prefetch arrays
    # idx_ref : (1, P_pad) int32  -- sorted flat destination column per pillar
    # pf_ref  : (C, P_pad)        -- pillar features, columns sorted like idx_ref
    # out_ref : (C, tile_n)       -- one lane-dense slab of the flat BEV canvas
    # acc     : optional (C, tile_n) f32 VMEM accumulator (absent if out is f32)
    j = pl.program_id(0)
    nchunks = nchunk_ref[j]
    acc_ref = acc[0] if acc else out_ref   # f32 output: accumulate in place

    @pl.when(nchunks == 0)
    def _():
        # Fast path: no pillar lands in this slab.
        out_ref[...] = jnp.zeros_like(out_ref)

    @pl.when(nchunks > 0)
    def _():
        acc_ref[...] = jnp.zeros_like(acc_ref)
        # Global column ids covered by this slab, laid out (tile_n, kc) so the
        # one-hot is built directly from the (1, kc) idx slice (no transposes).
        col = jax.lax.broadcasted_iota(jnp.int32, (tile_n, kc), 0) + j * tile_n
        start = start_ref[j]          # chunk-aligned start into sorted pillars

        def body(ci, carry):
            k0 = pl.multiple_of(start + ci * kc, kc)
            pf_chunk = pf_ref[:, pl.ds(k0, kc)]            # (C, kc), native dtype
            idx_chunk = idx_ref[:, pl.ds(k0, kc)]          # (1, kc)
            onehot_t = (idx_chunk == col).astype(pf_chunk.dtype)   # (tile_n, kc)
            # (C, kc) x (tile_n, kc) contracted over kc -> (C, tile_n) on the MXU.
            acc_ref[...] += jax.lax.dot_general(
                pf_chunk, onehot_t,
                dimension_numbers=(((1,), (1,)), ((), ())),
                preferred_element_type=jnp.float32)
            return carry

        jax.lax.fori_loop(0, nchunks, body, 0)
        if acc:
            out_ref[...] = acc_ref[...].astype(out_ref.dtype)


def pointpillar_scatter(pillar_features, coords, *, nx, ny, nz,
                        tile_n=1024, kc=256):
    """pillar_features: (C, P); coords: (1, P, 3) -> (1, C*nz, ny, nx)."""
    assert nz == 1
    assert tile_n % 128 == 0 and kc % 128 == 0
    c, p = pillar_features.shape
    dtype = pillar_features.dtype
    nspatial = nz * nx * ny

    # Don't let the slab be needlessly wider than the (128-rounded) canvas.
    tile_n = min(tile_n, pl.cdiv(nspatial, 128) * 128)
    n_tiles = pl.cdiv(nspatial, tile_n)

    # ---- wrapper-side index math / bucketing (cheap O(P) glue) ----
    coords_pt = coords[0].astype(jnp.int32)                             # (P, 3)
    idx = coords_pt[:, 0] + coords_pt[:, 1] * nx + coords_pt[:, 2]      # (P,)

    order = jnp.argsort(idx)                                            # stable
    idx_sorted = idx[order]
    # TODO(synk): lane-axis gather of C*P elements; for very large P consider
    # reusing the sort across frames or gathering along the sublane axis.
    pf_sorted = jnp.take(pillar_features, order, axis=1)

    # Per-tile contiguous pillar ranges (in sorted order), chunk-aligned.
    tile_edges = jnp.arange(n_tiles + 1, dtype=jnp.int32) * tile_n
    bounds = jnp.searchsorted(idx_sorted, tile_edges).astype(jnp.int32)
    starts = ((bounds[:-1] // kc) * kc).astype(jnp.int32)
    nchunks = (bounds[1:] - starts + kc - 1) // kc
    nchunks = jnp.where(bounds[1:] > bounds[:-1], nchunks, 0).astype(jnp.int32)

    # Pad pillars to a multiple of the K-chunk; sentinel indices never match a
    # slab column and the padded features are zero -> over-reads are harmless.
    p_pad = pl.cdiv(p, kc) * kc
    pad = p_pad - p
    if pad:
        idx_sorted = jnp.concatenate(
            [idx_sorted, jnp.full((pad,), 2 ** 30, jnp.int32)])
        pf_sorted = jnp.pad(pf_sorted, ((0, 0), (0, pad)))
    idx_2d = idx_sorted[None, :]                                        # (1, P_pad)

    out_is_f32 = dtype == jnp.float32
    scratch = [] if out_is_f32 else [pltpu.VMEM((c, tile_n), jnp.float32)]

    # VMEM budget: single-buffered resident inputs + double-buffered out block.
    itemsize = jnp.dtype(dtype).itemsize
    vmem_bytes = (c * p_pad * itemsize            # pf, fully resident (1 copy)
                  + 8 * p_pad * 4                 # idx, sublane-padded
                  + 2 * c * tile_n * itemsize     # double-buffered out block
                  + (0 if out_is_f32 else c * tile_n * 4)
                  + 2 * tile_n * kc * 4           # col iota / one-hot temporaries
                  + (4 << 20))                    # Mosaic internal slack
    vmem_limit = int(min(max(vmem_bytes, 32 << 20), 100 << 20))

    flat = pl.pallas_call(
        functools.partial(_scatter_kernel, tile_n=tile_n, kc=kc),
        out_shape=jax.ShapeDtypeStruct((c, nspatial), dtype),
        grid_spec=pltpu.PrefetchScalarGridSpec(
            num_scalar_prefetch=2,
            grid=(n_tiles,),
            in_specs=[
                # Whole-array, single-buffered VMEM residents (no pipelining).
                pl.BlockSpec(memory_space=pltpu.MemorySpace.VMEM),  # sorted idx
                pl.BlockSpec(memory_space=pltpu.MemorySpace.VMEM),  # sorted pf
            ],
            out_specs=pl.BlockSpec((c, tile_n), lambda j, s, n: (0, j)),
            scratch_shapes=scratch,
        ),
        compiler_params=pltpu.CompilerParams(
            dimension_semantics=("parallel",),   # lets v7x shard tiles across TCs
            vmem_limit_bytes=vmem_limit,
        ),
    )(starts, nchunks, idx_2d, pf_sorted)

    # Mirrors torch's .view(1, C*nz, ny, nx); pure metadata reshape, no copy.
    return flat.reshape(1, c * nz, ny, nx)


if __name__ == "__main__":
    key = jax.random.PRNGKey(0)

    # (C, NX, NY, P, tile_n, dtype, atol)
    cases = [
        (64, 32, 32, 64, 1024, jnp.float32, 1e-6),    # tile-aligned canvas
        (64, 48, 40, 100, 1024, jnp.float32, 1e-6),   # masked partial tail slab
        (32, 32, 24, 50, 512, jnp.bfloat16, 1e-2),    # f32-acc-scratch path
    ]

    for (C, NX, NY, P, tn, dt, atol) in cases:
        NZ = 1
        key, k_feat, k_perm = jax.random.split(key, 3)
        nspatial = NZ * NX * NY

        # Unique flat BEV positions for the pillars (PointPillars invariant).
        flat_idx = jax.random.permutation(k_perm, nspatial)[:P].astype(jnp.int32)
        c0 = flat_idx % NX            # contributes the "+ coords[:,:,0]" term
        c1 = flat_idx // NX           # contributes the "* nx" term
        c2 = jnp.zeros_like(flat_idx)
        coords = jnp.stack([c0, c1, c2], axis=-1)[None, :, :]           # (1, P, 3)

        pillar_features = jax.random.normal(k_feat, (C, P), dtype=dt)

        out = pointpillar_scatter(pillar_features, coords, nx=NX, ny=NY, nz=NZ,
                                  tile_n=tn)
        out = jax.block_until_ready(out)

        # Pure-JAX reference of the PyTorch forward.
        ref_flat = jnp.zeros((C, nspatial), dt).at[:, flat_idx].set(
            pillar_features)
        ref = ref_flat.reshape(1, C * NZ, NY, NX)

        assert out.shape == (1, C * NZ, NY, NX)
        assert jnp.allclose(out.astype(jnp.float32), ref.astype(jnp.float32),
                            atol=atol), "mismatch vs reference"

    print("KERNEL_OK")
</pallas_src>

<mosaic_0001>
module attributes {stable_mosaic.version = 11 : i64} {
  func.func @_scatter_kernel(%arg0: i32, %arg1: memref<1xi32, #tpu.memory_space<smem>>, %arg2: memref<1xi32, #tpu.memory_space<smem>>, %arg3: memref<1x256xi32, #tpu.memory_space<vmem>>, %arg4: memref<64x256xf32, #tpu.memory_space<vmem>>, %arg5: memref<64x1024xf32, #tpu.memory_space<vmem>>) attributes {dimension_semantics = [#tpu.dimension_semantics<parallel>], iteration_bounds = array<i64: 1>, scalar_prefetch = 2 : i64, scratch_operands = 0 : i64, tpu.core_type = #tpu.core_type<tc>, window_params = [{pipeline_mode = #tpu.pipeline_mode<synchronous>, transform_indices = @transform_0, window_bounds = array<i64: 1, 256>}, {pipeline_mode = #tpu.pipeline_mode<synchronous>, transform_indices = @transform_1, window_bounds = array<i64: 64, 256>}, {transform_indices = @transform_2, window_bounds = array<i64: 64, 1024>}]} {
    %0 = arith.index_cast %arg0 : i32 to index
    %1 = memref.load %arg2[%0] : memref<1xi32, #tpu.memory_space<smem>>
    %c0_i32 = arith.constant 0 : i32
    %2 = arith.cmpi eq, %1, %c0_i32 : i32
    %3 = arith.extui %2 : i1 to i32
    %c0_i32_0 = arith.constant 0 : i32
    %4 = arith.cmpi ne, %3, %c0_i32_0 : i32
    scf.if %4 {
      %cst = arith.constant 0.000000e+00 : f32
      %8 = vector.broadcast %cst : f32 to vector<64x1024xf32>
      %c0 = arith.constant 0 : index
      %c0_3 = arith.constant 0 : index
      %9 = vector.load %arg5[%c0, %c0_3] : memref<64x1024xf32, #tpu.memory_space<vmem>>, vector<64x1024xf32>
      tpu.vector_store %arg5[%c0, %c0_3], %8 {strides = array<i32>} : memref<64x1024xf32, #tpu.memory_space<vmem>>, vector<64x1024xf32>,
    } else {
    }
    %c0_i32_1 = arith.constant 0 : i32
    %5 = arith.cmpi sgt, %1, %c0_i32_1 : i32
    %6 = arith.extui %5 : i1 to i32
    %c0_i32_2 = arith.constant 0 : i32
    %7 = arith.cmpi ne, %6, %c0_i32_2 : i32
    scf.if %7 {
      %cst = arith.constant 0.000000e+00 : f32
      %8 = vector.broadcast %cst : f32 to vector<64x1024xf32>
      %c0 = arith.constant 0 : index
      %c0_3 = arith.constant 0 : index
      %9 = vector.load %arg5[%c0, %c0_3] : memref<64x1024xf32, #tpu.memory_space<vmem>>, vector<64x1024xf32>
      tpu.vector_store %arg5[%c0, %c0_3], %8 {strides = array<i32>} : memref<64x1024xf32, #tpu.memory_space<vmem>>, vector<64x1024xf32>,
      %10 = tpu.iota {dimensions = array<i32: 0>} : vector<1024x256xi32>
      %c1024_i32 = arith.constant 1024 : i32
      %11 = arith.muli %arg0, %c1024_i32 : i32
      %12 = vector.broadcast %11 : i32 to vector<1024x256xi32>
      %13 = arith.addi %10, %12 : vector<1024x256xi32>
      %14 = arith.index_cast %arg0 : i32 to index
      %15 = memref.load %arg1[%14] : memref<1xi32, #tpu.memory_space<smem>>
      %c0_i32_4 = arith.constant 0 : i32
      %c0_i32_5 = arith.constant 0 : i32
      %16 = arith.subi %1, %c0_i32_5 : i32
      %17 = arith.addi %c0_i32_5, %16 : i32
      %c1_i32 = arith.constant 1 : i32
      scf.for %arg6 = %c0_i32_5 to %17 step %c1_i32  : i32 {
        %c256_i32 = arith.constant 256 : i32
        %18 = arith.muli %arg6, %c256_i32 : i32
        %19 = arith.addi %15, %18 : i32
        %20 = tpu.assume_multiple %19, 256 : i32
        %c0_6 = arith.constant 0 : index
        %21 = arith.index_cast %20 : i32 to index
        %22 = vector.load %arg4[%c0_6, %21] : memref<64x256xf32, #tpu.memory_space<vmem>>, vector<64x256xf32>
        %c0_7 = arith.constant 0 : index
        %23 = arith.index_cast %20 : i32 to index
        %24 = vector.load %arg3[%c0_7, %23] : memref<1x256xi32, #tpu.memory_space<vmem>>, vector<1x256xi32>
        %25 = vector.broadcast %24 : vector<1x256xi32> to vector<1024x256xi32>
        %26 = arith.cmpi eq, %25, %13 : vector<1024x256xi32>
        %27 = arith.extui %26 : vector<1024x256xi1> to vector<1024x256xi32>
        %28 = arith.sitofp %27 : vector<1024x256xi32> to vector<1024x256xf32>
        %c0_8 = arith.constant 0 : index
        %c0_9 = arith.constant 0 : index
        %29 = vector.load %arg5[%c0_8, %c0_9] : memref<64x1024xf32, #tpu.memory_space<vmem>>, vector<64x1024xf32>
        %cst_10 = arith.constant dense<0.000000e+00> : vector<64x1024xf32>
        %30 = tpu.matmul %22, %28, %cst_10 {dimension_numbers = #tpu.dot_dimension_numbers<[1], [1], [0], [0], [0, 0, 1, 0], [], []>} : vector<64x256xf32>, vector<1024x256xf32>, vector<64x1024xf32> -> vector<64x1024xf32>
        %31 = arith.addf %29, %30 : vector<64x1024xf32>
        %c0_11 = arith.constant 0 : index
        %c0_12 = arith.constant 0 : index
        %32 = vector.load %arg5[%c0_11, %c0_12] : memref<64x1024xf32, #tpu.memory_space<vmem>>, vector<64x1024xf32>
        tpu.vector_store %arg5[%c0_11, %c0_12], %31 {strides = array<i32>} : memref<64x1024xf32, #tpu.memory_space<vmem>>, vector<64x1024xf32>,
      }
    } else {
    }
    return
  }
  func.func @transform_0(%arg0: i32, %arg1: memref<1xi32, #tpu.memory_space<smem>>, %arg2: memref<1xi32, #tpu.memory_space<smem>>) -> (i32, i32) {
    %c0_i32 = arith.constant 0 : i32
    %c0_i32_0 = arith.constant 0 : i32
    %c0_i32_1 = arith.constant 0 : i32
    return %c0_i32, %c0_i32_0 : i32, i32
  }
  func.func @transform_1(%arg0: i32, %arg1: memref<1xi32, #tpu.memory_space<smem>>, %arg2: memref<1xi32, #tpu.memory_space<smem>>) -> (i32, i32) {
    %c0_i32 = arith.constant 0 : i32
    %c0_i32_0 = arith.constant 0 : i32
    %c0_i32_1 = arith.constant 0 : i32
    return %c0_i32, %c0_i32_0 : i32, i32
  }
  func.func @transform_2(%arg0: i32, %arg1: memref<1xi32, #tpu.memory_space<smem>>, %arg2: memref<1xi32, #tpu.memory_space<smem>>) -> (i32, i32) {
    %c0_i32 = arith.constant 0 : i32
    %c0_i32_0 = arith.constant 0 : i32
    return %c0_i32, %arg0 : i32, i32
  }
}

</mosaic_0001>

<bundles_post_ra>
// kernel: tpu_custom_call.1
= control target key start
LH: loop header
LB: loop body
LE: loop exit
PB: predicated region body
PF: predicated region fallthrough
CT: control target
= control target key end

     0   :  { %s4113_s0 = inlined_call_operand.<no memory space> [shape: s32[1], index: 0, kind: input, shape index: {}]   ;;  %s4114_s1 = inlined_call_operand.<no memory space> [shape: s32[1], index: 1, kind: input, shape index: {}]   ;;  %s4115_s2 = inlined_call_operand.vmem [shape: s32[1,256], index: 2, kind: input, shape index: {}]   ;;  %s4116_s3 = inlined_call_operand.hbm [shape: f32[64,256], index: 3, kind: input, shape index: {}]   ;;  %s4117_s4 = inlined_call_operand.hbm [shape: f32[64,1024], index: 4, kind: output, shape index: {}]  }
   0x1   :  { %9 = sst [smem:[#allocation3]] %s4113_s0 }
   0x2   :  { %11 = vsyncpa [#allocation6], 0 }
   0x3   :  { %12 = vsyncpa [#allocation7], 0  ;;  %s2748_s17 = smov [#allocation5]   ;;  %s2692_s21 = scalar_lea.hbm %s4116_s3, 2048 }
   0x4   :  { %s20_s18 = sshll.u32 %s2748_s17, 4  ;;  %p2693_p0 = scmp.ne.s32.totalorder %s4116_s3, %s2692_s21  ;;  %s21_s18 = int_to_ptr.vmem [resolvable:$true] %s20_s18 }
   0x5   :  { %p2696_p1 = scmp.lt.u32.totalorder %s2692_s21, %s4116_s3 }
   0x7   :  { %p2698_p2 = pnand %p2696_p1, %p2693_p0 }
   0x9   :  { %2701 = shalt.err (!%p2698_p2)
}
   0xa   :  { %s2702_s0 = scalar_lea.vmem %s21_s18, 2048  ;;  %p2707_p4 = scmp.lt.s32.totalorder %s21_s18, %s21_s18 }
   0xb   :  { %p2703_p3 = scmp.ne.s32.totalorder %s21_s18, %s2702_s0  ;;  %p2708_p5 = scmp.lt.s32.totalorder %s2702_s0, %s2702_s0 }
   0xd   :  { %p2709_p6 = por %p2708_p5, %p2707_p4 }
   0xf   :  { %p2710_p7 = pnand %p2709_p6, %p2703_p3 }
  0x11   :  { %2713 = shalt.err (!%p2710_p7)
}
  0x12   :  { %s2749_s26 = smov 256   ;;  %s2750_s27 = smov 16  }
  0x13   :  { %26 = dma.hbm_to_vmem [thread:$0]  %s4116_s3, 2048, %s21_s18, [#allocation6], %s2749_s26, %s2749_s26, %s2750_s27  }
  0x14   :  { %2740 = dma.done.wait [#allocation6], 2048  }
  0x15   :  { %2741 = vsyncadd [#allocation6], 4294965248  ;;  %p1902_p8 = scmp.ne.s32.totalorder %s4114_s1, 0 }
  0x16   :  { %v2751_v0 = vmov (!%p1902_p8), 0.0  }
  0x17   :  { %34 = sbr.rel (%p1902_p8) target bundleno = 55 (0x37), region = 17  ;;  %35 = vst [vmem:[#allocation8] sm:$0xff] (!%p1902_p8), %v2751_v0  ;;  %36 = vst [vmem:[#allocation8 + $0x8] sm:$0xff] (!%p1902_p8), %v2751_v0 }
  0x18   :  { %37 = vst [vmem:[#allocation8 + $0x10] sm:$0xff] (!%p1902_p8), %v2751_v0  ;;  %38 = vst [vmem:[#allocation8 + $0x18] sm:$0xff] (!%p1902_p8), %v2751_v0 }
  0x19   :  { %39 = vst [vmem:[#allocation8 + $0x20] sm:$0xff] (!%p1902_p8), %v2751_v0  ;;  %40 = vst [vmem:[#allocation8 + $0x28] sm:$0xff] (!%p1902_p8), %v2751_v0 }
  0x1a   :  { %41 = vst [vmem:[#allocation8 + $0x30] sm:$0xff] (!%p1902_p8), %v2751_v0  ;;  %42 = vst [vmem:[#allocation8 + $0x38] sm:$0xff] (!%p1902_p8), %v2751_v0 }
  0x1b   :  { %43 = vst [vmem:[#allocation8 + $0x40] sm:$0xff] (!%p1902_p8), %v2751_v0  ;;  %44 = vst [vmem:[#allocation8 + $0x48] sm:$0xff] (!%p1902_p8), %v2751_v0 }
  0x1c   :  { %45 = vst [vmem:[#allocation8 + $0x50] sm:$0xff] (!%p1902_p8), %v2751_v0  ;;  %46 = vst [vmem:[#allocation8 + $0x58] sm:$0xff] (!%p1902_p8), %v2751_v0 }
  0x1d   :  { %47 = vst [vmem:[#allocation8 + $0x60] sm:$0xff] (!%p1902_p8), %v2751_v0  ;;  %48 = vst [vmem:[#allocation8 + $0x68] sm:$0xff] (!%p1902_p8), %v2751_v0 }
  0x1e   :  { %49 = vst [vmem:[#allocation8 + $0x70] sm:$0xff] %v2751_v0  ;;  %50 = vst [vmem:[#allocation8 + $0x78] sm:$0xff] %v2751_v0 }
  0x1f   :  { %51 = vst [vmem:[#allocation8 + $0x80] sm:$0xff] %v2751_v0  ;;  %52 = vst [vmem:[#allocation8 + $0x88] sm:$0xff] %v2751_v0 }
  0x20   :  { %53 = vst [vmem:[#allocation8 + $0x90] sm:$0xff] %v2751_v0  ;;  %54 = vst [vmem:[#allocation8 + $0x98] sm:$0xff] %v2751_v0 }
  0x21   :  { %55 = vst [vmem:[#allocation8 + $0xa0] sm:$0xff] %v2751_v0  ;;  %56 = vst [vmem:[#allocation8 + $0xa8] sm:$0xff] %v2751_v0 }
  0x22   :  { %57 = vst [vmem:[#allocation8 + $0xb0] sm:$0xff] %v2751_v0  ;;  %58 = vst [vmem:[#allocation8 + $0xb8] sm:$0xff] %v2751_v0 }
  0x23   :  { %59 = vst [vmem:[#allocation8 + $0xc0] sm:$0xff] %v2751_v0  ;;  %60 = vst [vmem:[#allocation8 + $0xc8] sm:$0xff] %v2751_v0 }
  0x24   :  { %61 = vst [vmem:[#allocation8 + $0xd0] sm:$0xff] %v2751_v0  ;;  %62 = vst [vmem:[#allocation8 + $0xd8] sm:$0xff] %v2751_v0 }
  0x25   :  { %63 = vst [vmem:[#allocation8 + $0xe0] sm:$0xff] %v2751_v0  ;;  %64 = vst [vmem:[#allocation8 + $0xe8] sm:$0xff] %v2751_v0 }
  0x26   :  { %65 = vst [vmem:[#allocation8 + $0xf0] sm:$0xff] %v2751_v0  ;;  %66 = vst [vmem:[#allocation8 + $0xf8] sm:$0xff] %v2751_v0 }
  0x27   :  { %67 = vst [vmem:[#allocation8 + $0x100] sm:$0xff] %v2751_v0  ;;  %68 = vst [vmem:[#allocation8 + $0x108] sm:$0xff] %v2751_v0 }
  0x28   :  { %69 = vst [vmem:[#allocation8 + $0x110] sm:$0xff] %v2751_v0  ;;  %70 = vst [vmem:[#allocation8 + $0x118] sm:$0xff] %v2751_v0 }
  0x29   :  { %71 = vst [vmem:[#allocation8 + $0x120] sm:$0xff] %v2751_v0  ;;  %72 = vst [vmem:[#allocation8 + $0x128] sm:$0xff] %v2751_v0 }
  0x2a   :  { %73 = vst [vmem:[#allocation8 + $0x130] sm:$0xff] %v2751_v0  ;;  %74 = vst [vmem:[#allocation8 + $0x138] sm:$0xff] %v2751_v0 }
  0x2b   :  { %75 = vst [vmem:[#allocation8 + $0x140] sm:$0xff] %v2751_v0  ;;  %76 = vst [vmem:[#allocation8 + $0x148] sm:$0xff] %v2751_v0 }
  0x2c   :  { %77 = vst [vmem:[#allocation8 + $0x150] sm:$0xff] %v2751_v0  ;;  %78 = vst [vmem:[#allocation8 + $0x158] sm:$0xff] %v2751_v0 }
  0x2d   :  { %79 = vst [vmem:[#allocation8 + $0x160] sm:$0xff] %v2751_v0  ;;  %80 = vst [vmem:[#allocation8 + $0x168] sm:$0xff] %v2751_v0 }
  0x2e   :  { %81 = vst [vmem:[#allocation8 + $0x170] sm:$0xff] %v2751_v0  ;;  %82 = vst [vmem:[#allocation8 + $0x178] sm:$0xff] %v2751_v0 }
  0x2f   :  { %83 = vst [vmem:[#allocation8 + $0x180] sm:$0xff] %v2751_v0  ;;  %84 = vst [vmem:[#allocation8 + $0x188] sm:$0xff] %v2751_v0 }
  0x30   :  { %85 = vst [vmem:[#allocation8 + $0x190] sm:$0xff] %v2751_v0  ;;  %86 = vst [vmem:[#allocation8 + $0x198] sm:$0xff] %v2751_v0 }
  0x31   :  { %87 = vst [vmem:[#allocation8 + $0x1a0] sm:$0xff] %v2751_v0  ;;  %88 = vst [vmem:[#allocation8 + $0x1a8] sm:$0xff] %v2751_v0 }
  0x32   :  { %89 = vst [vmem:[#allocation8 + $0x1b0] sm:$0xff] %v2751_v0  ;;  %90 = vst [vmem:[#allocation8 + $0x1b8] sm:$0xff] %v2751_v0 }
  0x33   :  { %91 = vst [vmem:[#allocation8 + $0x1c0] sm:$0xff] %v2751_v0  ;;  %92 = vst [vmem:[#allocation8 + $0x1c8] sm:$0xff] %v2751_v0 }
  0x34   :  { %93 = vst [vmem:[#allocation8 + $0x1d0] sm:$0xff] %v2751_v0  ;;  %94 = vst [vmem:[#allocation8 + $0x1d8] sm:$0xff] %v2751_v0 }
  0x35   :  { %95 = vst [vmem:[#allocation8 + $0x1e0] sm:$0xff] %v2751_v0  ;;  %96 = vst [vmem:[#allocation8 + $0x1e8] sm:$0xff] %v2751_v0 }
  0x36   :  { %97 = vst [vmem:[#allocation8 + $0x1f0] sm:$0xff] %v2751_v0  ;;  %98 = vst [vmem:[#allocation8 + $0x1f8] sm:$0xff] %v2751_v0 }
  0x37 PF:  { %p1903_p9 = scmp.le.s32.totalorder %s4114_s1, 0 }
  0x39   :  { %102 = sbr.rel (%p1903_p9) target bundleno = 658 (0x292), region = 21 }
  0x40   :  { %v167_v1 = vlaneseq  ;;  %s2871_s9 = sld [smem:[#allocation3]]  ;;  %v2752_v2 = vmov 0.0   ;;  %s3325_s12 = smov (!%p1903_p9), 0  }
  0x41   :  { %103 = vst [vmem:[#allocation8] sm:$0xff] %v2752_v2  ;;  %104 = vst [vmem:[#allocation8 + $0x8] sm:$0xff] %v2752_v2 }
  0x42   :  { %105 = vst [vmem:[#allocation8 + $0x10] sm:$0xff] %v2752_v2  ;;  %106 = vst [vmem:[#allocation8 + $0x18] sm:$0xff] %v2752_v2  ;;  %v2938_v3 = vshrl.u32 %v167_v1, 7 }
  0x43   :  { %107 = vst [vmem:[#allocation8 + $0x20] sm:$0xff] %v2752_v2  ;;  %108 = vst [vmem:[#allocation8 + $0x28] sm:$0xff] %v2752_v2 }
  0x44   :  { %109 = vst [vmem:[#allocation8 + $0x30] sm:$0xff] %v2752_v2  ;;  %110 = vst [vmem:[#allocation8 + $0x38] sm:$0xff] %v2752_v2  ;;  %v2941_v4 = vadd.s32 8, %v2938_v3  ;;  %v2944_v5 = vadd.s32 16, %v2938_v3  ;;  %v2947_v6 = vadd.s32 24, %v2938_v3  ;;  %v2950_v7 = vadd.s32 32, %v2938_v3 }
  0x45   :  { %111 = vst [vmem:[#allocation8 + $0x40] sm:$0xff] %v2752_v2  ;;  %112 = vst [vmem:[#allocation8 + $0x48] sm:$0xff] %v2752_v2  ;;  %v2953_v8 = vadd.s32 40, %v2938_v3  ;;  %v2956_v9 = vadd.s32 48, %v2938_v3  ;;  %v2959_v10 = vadd.s32 56, %v2938_v3  ;;  %v2962_v11 = vadd.s32 64, %v2938_v3 }
  0x46   :  { %113 = vst [vmem:[#allocation8 + $0x50] sm:$0xff] %v2752_v2  ;;  %114 = vst [vmem:[#allocation8 + $0x58] sm:$0xff] %v2752_v2  ;;  %v2965_v12 = vadd.s32 72, %v2938_v3  ;;  %v2968_v13 = vadd.s32 80, %v2938_v3  ;;  %v2971_v14 = vadd.s32 88, %v2938_v3  ;;  %v2974_v15 = vadd.s32 96, %v2938_v3 }
  0x47   :  { %115 = vst [vmem:[#allocation8 + $0x60] sm:$0xff] %v2752_v2  ;;  %116 = vst [vmem:[#allocation8 + $0x68] sm:$0xff] %v2752_v2  ;;  %v2977_v16 = vadd.s32 104, %v2938_v3  ;;  %v2980_v17 = vadd.s32 112, %v2938_v3  ;;  %v2983_v18 = vadd.s32 120, %v2938_v3  ;;  %v2986_v19 = vadd.s32 128, %v2938_v3 }
  0x48   :  { %117 = vst [vmem:[#allocation8 + $0x70] sm:$0xff] %v2752_v2  ;;  %118 = vst [vmem:[#allocation8 + $0x78] sm:$0xff] %v2752_v2  ;;  %v2989_v20 = vadd.s32 136, %v2938_v3  ;;  %v2992_v21 = vadd.s32 144, %v2938_v3  ;;  %v2995_v22 = vadd.s32 152, %v2938_v3  ;;  %v2998_v23 = vadd.s32 160, %v2938_v3 }
  0x49   :  { %119 = vst [vmem:[#allocation8 + $0x80] sm:$0xff] %v2752_v2  ;;  %120 = vst [vmem:[#allocation8 + $0x88] sm:$0xff] %v2752_v2  ;;  %v3001_v24 = vadd.s32 168, %v2938_v3  ;;  %v3004_v25 = vadd.s32 176, %v2938_v3  ;;  %v3007_v26 = vadd.s32 184, %v2938_v3  ;;  %v3010_v27 = vadd.s32 192, %v2938_v3 }
  0x4a   :  { %121 = vst [vmem:[#allocation8 + $0x90] sm:$0xff] %v2752_v2  ;;  %122 = vst [vmem:[#allocation8 + $0x98] sm:$0xff] %v2752_v2  ;;  %v3013_v28 = vadd.s32 200, %v2938_v3  ;;  %v3016_v29 = vadd.s32 208, %v2938_v3  ;;  %v3019_v30 = vadd.s32 216, %v2938_v3  ;;  %v3022_v31 = vadd.s32 224, %v2938_v3 }
  0x4b   :  { %123 = vst [vmem:[#allocation8 + $0xa0] sm:$0xff] %v2752_v2  ;;  %124 = vst [vmem:[#allocation8 + $0xa8] sm:$0xff] %v2752_v2  ;;  %v3025_v32 = vadd.s32 232, %v2938_v3  ;;  %v3028_v33 = vadd.s32 240, %v2938_v3  ;;  %v3031_v34 = vadd.s32 248, %v2938_v3  ;;  %v3034_v35 = vadd.s32 256, %v2938_v3 }
  0x4c   :  { %125 = vst [vmem:[#allocation8 + $0xb0] sm:$0xff] %v2752_v2  ;;  %126 = vst [vmem:[#allocation8 + $0xb8] sm:$0xff] %v2752_v2  ;;  %v3037_v36 = vadd.s32 264, %v2938_v3  ;;  %v3040_v37 = vadd.s32 272, %v2938_v3  ;;  %v3043_v38 = vadd.s32 280, %v2938_v3  ;;  %v3046_v39 = vadd.s32 288, %v2938_v3 }
  0x4d   :  { %127 = vst [vmem:[#allocation8 + $0xc0] sm:$0xff] %v2752_v2  ;;  %128 = vst [vmem:[#allocation8 + $0xc8] sm:$0xff] %v2752_v2  ;;  %v3049_v40 = vadd.s32 296, %v2938_v3  ;;  %v3052_v41 = vadd.s32 304, %v2938_v3  ;;  %v3055_v42 = vadd.s32 312, %v2938_v3  ;;  %v3058_v43 = vadd.s32 320, %v2938_v3 }
  0x4e   :  { %129 = vst [vmem:[#allocation8 + $0xd0] sm:$0xff] %v2752_v2  ;;  %130 = vst [vmem:[#allocation8 + $0xd8] sm:$0xff] %v2752_v2  ;;  %v3061_v44 = vadd.s32 328, %v2938_v3  ;;  %v3064_v45 = vadd.s32 336, %v2938_v3  ;;  %v3067_v46 = vadd.s32 344, %v2938_v3  ;;  %v3070_v47 = vadd.s32 352, %v2938_v3 }
  0x4f   :  { %131 = vst [vmem:[#allocation8 + $0xe0] sm:$0xff] %v2752_v2  ;;  %132 = vst [vmem:[#allocation8 + $0xe8] sm:$0xff] %v2752_v2  ;;  %v3073_v48 = vadd.s32 360, %v2938_v3  ;;  %v3076_v49 = vadd.s32 368, %v2938_v3  ;;  %v3079_v50 = vadd.s32 376, %v2938_v3  ;;  %v3082_v51 = vadd.s32 384, %v2938_v3 }
  0x50   :  { %133 = vst [vmem:[#allocation8 + $0xf0] sm:$0xff] %v2752_v2  ;;  %134 = vst [vmem:[#allocation8 + $0xf8] sm:$0xff] %v2752_v2  ;;  %v3085_v52 = vadd.s32 392, %v2938_v3  ;;  %v3088_v53 = vadd.s32 400, %v2938_v3  ;;  %v3091_v54 = vadd.s32 408, %v2938_v3  ;;  %v3094_v55 = vadd.s32 416, %v2938_v3 }
  0x51   :  { %135 = vst [vmem:[#allocation8 + $0x100] sm:$0xff] %v2752_v2  ;;  %136 = vst [vmem:[#allocation8 + $0x108] sm:$0xff] %v2752_v2  ;;  %v3097_v56 = vadd.s32 424, %v2938_v3  ;;  %v3100_v57 = vadd.s32 432, %v2938_v3  ;;  %v3103_v58 = vadd.s32 440, %v2938_v3  ;;  %v3106_v59 = vadd.s32 448, %v2938_v3 }
  0x52   :  { %137 = vst [vmem:[#allocation8 + $0x110] sm:$0xff] %v2752_v2  ;;  %138 = vst [vmem:[#allocation8 + $0x118] sm:$0xff] %v2752_v2  ;;  %v3109_v60 = vadd.s32 456, %v2938_v3  ;;  %v3112_v61 = vadd.s32 464, %v2938_v3  ;;  %v3115_v62 = vadd.s32 472, %v2938_v3  ;;  %v3118_v63 = vadd.s32 480, %v2938_v3 }
  0x53   :  { %139 = vst [vmem:[#allocation8 + $0x120] sm:$0xff] %v2752_v2  ;;  %140 = vst [vmem:[#allocation8 + $0x128] sm:$0xff] %v2752_v2  ;;  %v3121_v0 = vadd.s32 488, %v2938_v3  ;;  %v3124_v1 = vadd.s32 496, %v2938_v3 }
  0x54   :  { %141 = vst [vmem:[#allocation8 + $0x130] sm:$0xff] %v2752_v2  ;;  %142 = vst [vmem:[#allocation8 + $0x138] sm:$0xff] %v2752_v2 }
  0x55   :  { %143 = vst [vmem:[#allocation8 + $0x140] sm:$0xff] %v2752_v2  ;;  %144 = vst [vmem:[#allocation8 + $0x148] sm:$0xff] %v2752_v2 }
  0x56   :  { %145 = vst [vmem:[#allocation8 + $0x150] sm:$0xff] %v2752_v2  ;;  %146 = vst [vmem:[#allocation8 + $0x158] sm:$0xff] %v2752_v2 }
  0x57   :  { %147 = vst [vmem:[#allocation8 + $0x160] sm:$0xff] %v2752_v2  ;;  %148 = vst [vmem:[#allocation8 + $0x168] sm:$0xff] %v2752_v2 }
  0x58   :  { %149 = vst [vmem:[#allocation8 + $0x170] sm:$0xff] %v2752_v2  ;;  %150 = vst [vmem:[#allocation8 + $0x178] sm:$0xff] %v2752_v2 }
  0x59   :  { %151 = vst [vmem:[#allocation8 + $0x180] sm:$0xff] %v2752_v2  ;;  %152 = vst [vmem:[#allocation8 + $0x188] sm:$0xff] %v2752_v2 }
  0x5a   :  { %153 = vst [vmem:[#allocation8 + $0x190] sm:$0xff] %v2752_v2  ;;  %154 = vst [vmem:[#allocation8 + $0x198] sm:$0xff] %v2752_v2 }
  0x5b   :  { %155 = vst [vmem:[#allocation8 + $0x1a0] sm:$0xff] %v2752_v2  ;;  %156 = vst [vmem:[#allocation8 + $0x1a8] sm:$0xff] %v2752_v2 }
  0x5c   :  { %157 = vst [vmem:[#allocation8 + $0x1b0] sm:$0xff] %v2752_v2  ;;  %158 = vst [vmem:[#allocation8 + $0x1b8] sm:$0xff] %v2752_v2 }
  0x5d   :  { %159 = vst [vmem:[#allocation8 + $0x1c0] sm:$0xff] %v2752_v2  ;;  %160 = vst [vmem:[#allocation8 + $0x1c8] sm:$0xff] %v2752_v2 }
  0x5e   :  { %161 = vst [vmem:[#allocation8 + $0x1d0] sm:$0xff] %v2752_v2  ;;  %162 = vst [vmem:[#allocation8 + $0x1d8] sm:$0xff] %v2752_v2 }
  0x5f   :  { %163 = vst [vmem:[#allocation8 + $0x1e0] sm:$0xff] %v2752_v2  ;;  %164 = vst [vmem:[#allocation8 + $0x1e8] sm:$0xff] %v2752_v2 }
  0x60   :  { %165 = vst [vmem:[#allocation8 + $0x1f0] sm:$0xff] %v2752_v2  ;;  %166 = vst [vmem:[#allocation8 + $0x1f8] sm:$0xff] %v2752_v2  ;;  %v3127_v2 = vadd.s32 504, %v2938_v3 }
  0x61   :  { %4277 = vst [vmem:[#allocation11_spill] sm:$0xff] %v2938_v3  ;;  %4278 = vst [vmem:[#allocation12_spill] sm:$0xff] %v2941_v4 }
  0x62   :  { %4279 = vst [vmem:[#allocation13_spill] sm:$0xff] %v2944_v5  ;;  %4280 = vst [vmem:[#allocation14_spill] sm:$0xff] %v2947_v6 }
  0x63   :  { %4281 = vst [vmem:[#allocation15_spill] sm:$0xff] %v2950_v7  ;;  %4282 = vst [vmem:[#allocation16_spill] sm:$0xff] %v2953_v8 }
  0x64   :  { %4283 = vst [vmem:[#allocation17_spill] sm:$0xff] %v2956_v9  ;;  %4284 = vst [vmem:[#allocation18_spill] sm:$0xff] %v2959_v10 }
  0x65   :  { %4285 = vst [vmem:[#allocation19_spill] sm:$0xff] %v2962_v11  ;;  %4286 = vst [vmem:[#allocation20_spill] sm:$0xff] %v2965_v12 }
  0x66   :  { %4287 = vst [vmem:[#allocation21_spill] sm:$0xff] %v2968_v13  ;;  %4288 = vst [vmem:[#allocation22_spill] sm:$0xff] %v2971_v14 }
  0x67   :  { %4289 = vst [vmem:[#allocation23_spill] sm:$0xff] %v2974_v15  ;;  %4290 = vst [vmem:[#allocation24_spill] sm:$0xff] %v2977_v16 }
  0x68   :  { %4291 = vst [vmem:[#allocation25_spill] sm:$0xff] %v2980_v17  ;;  %4292 = vst [vmem:[#allocation26_spill] sm:$0xff] %v2983_v18 }
  0x69   :  { %4293 = vst [vmem:[#allocation27_spill] sm:$0xff] %v2986_v19  ;;  %4294 = vst [vmem:[#allocation28_spill] sm:$0xff] %v2989_v20 }
  0x6a   :  { %4295 = vst [vmem:[#allocation29_spill] sm:$0xff] %v2992_v21  ;;  %4296 = vst [vmem:[#allocation30_spill] sm:$0xff] %v2995_v22 }
  0x6b   :  { %4297 = vst [vmem:[#allocation31_spill] sm:$0xff] %v2998_v23  ;;  %4298 = vst [vmem:[#allocation32_spill] sm:$0xff] %v3025_v32  ;;  %v3136_v32 = vadd.s32 528, %v2938_v3 }
  0x6c   :  { %4299 = vst [vmem:[#allocation33_spill] sm:$0xff] %v3028_v33  ;;  %4300 = vst [vmem:[#allocation34_spill] sm:$0xff] %v3031_v34  ;;  %v3130_v34 = vadd.s32 512, %v2938_v3  ;;  %v3133_v33 = vadd.s32 520, %v2938_v3 }
  0x6d   :  { %4301 = vst [vmem:[#allocation35_spill] sm:$0xff] %v3118_v63  ;;  %4302 = vst [vmem:[#allocation36_spill] sm:$0xff] %v3121_v0  ;;  %v3139_v63 = vadd.s32 536, %v2938_v3  ;;  %v3142_v0 = vadd.s32 544, %v2938_v3 }
  0x6e   :  { %4303 = vst [vmem:[#allocation37_spill] sm:$0xff] %v3124_v1  ;;  %4304 = vst [vmem:[#allocation38_spill] sm:$0xff] %v3127_v2  ;;  %v3145_v1 = vadd.s32 552, %v2938_v3  ;;  %v3148_v2 = vadd.s32 560, %v2938_v3 }
  0x6f   :  { %4305 = vst [vmem:[#allocation39_spill] sm:$0xff] %v3130_v34  ;;  %4306 = vst [vmem:[#allocation40_spill] sm:$0xff] %v3133_v33  ;;  %v3151_v34 = vadd.s32 568, %v2938_v3  ;;  %v3154_v33 = vadd.s32 576, %v2938_v3 }
  0x70   :  { %4307 = vst [vmem:[#allocation41_spill] sm:$0xff] %v3136_v32  ;;  %4308 = vst [vmem:[#allocation42_spill] sm:$0xff] %v3139_v63  ;;  %v3157_v32 = vadd.s32 584, %v2938_v3  ;;  %v3160_v63 = vadd.s32 592, %v2938_v3 }
  0x71   :  { %4309 = vst [vmem:[#allocation43_spill] sm:$0xff] %v3142_v0  ;;  %4310 = vst [vmem:[#allocation44_spill] sm:$0xff] %v3145_v1  ;;  %v3163_v0 = vadd.s32 600, %v2938_v3  ;;  %v3166_v1 = vadd.s32 608, %v2938_v3 }
  0x72   :  { %4311 = vst [vmem:[#allocation45_spill] sm:$0xff] %v3148_v2  ;;  %4312 = vst [vmem:[#allocation46_spill] sm:$0xff] %v3151_v34  ;;  %v3169_v2 = vadd.s32 616, %v2938_v3  ;;  %v3172_v34 = vadd.s32 624, %v2938_v3 }
  0x73   :  { %4313 = vst [vmem:[#allocation47_spill] sm:$0xff] %v3154_v33  ;;  %4314 = vst [vmem:[#allocation48_spill] sm:$0xff] %v3157_v32  ;;  %v3175_v33 = vadd.s32 632, %v2938_v3  ;;  %v3178_v32 = vadd.s32 640, %v2938_v3 }
  0x74   :  { %4315 = vst [vmem:[#allocation49_spill] sm:$0xff] %v3160_v63  ;;  %4316 = vst [vmem:[#allocation50_spill] sm:$0xff] %v3163_v0  ;;  %v3181_v63 = vadd.s32 648, %v2938_v3  ;;  %v3184_v0 = vadd.s32 656, %v2938_v3 }
  0x75   :  { %4317 = vst [vmem:[#allocation51_spill] sm:$0xff] %v3166_v1  ;;  %4318 = vst [vmem:[#allocation52_spill] sm:$0xff] %v3169_v2  ;;  %v3187_v1 = vadd.s32 664, %v2938_v3  ;;  %v3190_v2 = vadd.s32 672, %v2938_v3 }
  0x76   :  { %4319 = vst [vmem:[#allocation53_spill] sm:$0xff] %v3172_v34  ;;  %4320 = vst [vmem:[#allocation54_spill] sm:$0xff] %v3175_v33  ;;  %v3193_v34 = vadd.s32 680, %v2938_v3  ;;  %v3196_v33 = vadd.s32 688, %v2938_v3 }
  0x77   :  { %4321 = vst [vmem:[#allocation55_spill] sm:$0xff] %v3178_v32  ;;  %4322 = vst [vmem:[#allocation56_spill] sm:$0xff] %v3181_v63  ;;  %v3199_v32 = vadd.s32 696, %v2938_v3  ;;  %v3202_v63 = vadd.s32 704, %v2938_v3 }
  0x78   :  { %4323 = vst [vmem:[#allocation57_spill] sm:$0xff] %v3184_v0  ;;  %4324 = vst [vmem:[#allocation58_spill] sm:$0xff] %v3187_v1  ;;  %v3205_v0 = vadd.s32 712, %v2938_v3  ;;  %v3208_v1 = vadd.s32 720, %v2938_v3 }
  0x79   :  { %4325 = vst [vmem:[#allocation59_spill] sm:$0xff] %v3190_v2  ;;  %4326 = vst [vmem:[#allocation60_spill] sm:$0xff] %v3193_v34  ;;  %v3211_v2 = vadd.s32 728, %v2938_v3  ;;  %v3214_v34 = vadd.s32 736, %v2938_v3 }
  0x7a   :  { %4327 = vst [vmem:[#allocation61_spill] sm:$0xff] %v3196_v33  ;;  %4328 = vst [vmem:[#allocation62_spill] sm:$0xff] %v3199_v32  ;;  %v3217_v33 = vadd.s32 744, %v2938_v3  ;;  %v3220_v32 = vadd.s32 752, %v2938_v3 }
  0x7b   :  { %4329 = vst [vmem:[#allocation63_spill] sm:$0xff] %v3202_v63  ;;  %4330 = vst [vmem:[#allocation64_spill] sm:$0xff] %v3205_v0  ;;  %v3223_v63 = vadd.s32 760, %v2938_v3  ;;  %v3226_v0 = vadd.s32 768, %v2938_v3 }
  0x7c   :  { %4331 = vst [vmem:[#allocation65_spill] sm:$0xff] %v3208_v1  ;;  %4332 = vst [vmem:[#allocation66_spill] sm:$0xff] %v3211_v2  ;;  %v3229_v1 = vadd.s32 776, %v2938_v3  ;;  %v3232_v2 = vadd.s32 784, %v2938_v3 }
  0x7d   :  { %4333 = vst [vmem:[#allocation67_spill] sm:$0xff] %v3214_v34  ;;  %4334 = vst [vmem:[#allocation68_spill] sm:$0xff] %v3217_v33  ;;  %v3235_v34 = vadd.s32 792, %v2938_v3  ;;  %v3238_v33 = vadd.s32 800, %v2938_v3 }
  0x7e   :  { %4335 = vst [vmem:[#allocation69_spill] sm:$0xff] %v3220_v32  ;;  %4336 = vst [vmem:[#allocation70_spill] sm:$0xff] %v3223_v63  ;;  %v3241_v32 = vadd.s32 808, %v2938_v3  ;;  %v3244_v63 = vadd.s32 816, %v2938_v3 }
  0x7f   :  { %4337 = vst [vmem:[#allocation71_spill] sm:$0xff] %v3226_v0  ;;  %4338 = vst [vmem:[#allocation72_spill] sm:$0xff] %v3229_v1  ;;  %v3247_v0 = vadd.s32 824, %v2938_v3  ;;  %v3250_v1 = vadd.s32 832, %v2938_v3 }
  0x80   :  { %4339 = vst [vmem:[#allocation73_spill] sm:$0xff] %v3232_v2  ;;  %4340 = vst [vmem:[#allocation74_spill] sm:$0xff] %v3235_v34  ;;  %v3253_v2 = vadd.s32 840, %v2938_v3  ;;  %v3256_v34 = vadd.s32 848, %v2938_v3 }
  0x81   :  { %4341 = vst [vmem:[#allocation75_spill] sm:$0xff] %v3238_v33  ;;  %4342 = vst [vmem:[#allocation76_spill] sm:$0xff] %v3241_v32  ;;  %v3259_v33 = vadd.s32 856, %v2938_v3  ;;  %v3262_v32 = vadd.s32 864, %v2938_v3 }
  0x82   :  { %4343 = vst [vmem:[#allocation77_spill] sm:$0xff] %v3244_v63  ;;  %4344 = vst [vmem:[#allocation78_spill] sm:$0xff] %v3247_v0  ;;  %v3265_v63 = vadd.s32 872, %v2938_v3  ;;  %v3268_v0 = vadd.s32 880, %v2938_v3 }
  0x83   :  { %4345 = vst [vmem:[#allocation79_spill] sm:$0xff] %v3250_v1  ;;  %4346 = vst [vmem:[#allocation80_spill] sm:$0xff] %v3253_v2  ;;  %v3271_v1 = vadd.s32 888, %v2938_v3  ;;  %v3274_v2 = vadd.s32 896, %v2938_v3 }
  0x84   :  { %4347 = vst [vmem:[#allocation81_spill] sm:$0xff] %v3256_v34  ;;  %4348 = vst [vmem:[#allocation82_spill] sm:$0xff] %v3259_v33  ;;  %v3277_v34 = vadd.s32 904, %v2938_v3  ;;  %v3280_v33 = vadd.s32 912, %v2938_v3 }
  0x85   :  { %4349 = vst [vmem:[#allocation83_spill] sm:$0xff] %v3262_v32  ;;  %4350 = vst [vmem:[#allocation84_spill] sm:$0xff] %v3265_v63  ;;  %v3283_v32 = vadd.s32 920, %v2938_v3  ;;  %v3286_v63 = vadd.s32 928, %v2938_v3 }
  0x86   :  { %4351 = vst [vmem:[#allocation85_spill] sm:$0xff] %v3268_v0  ;;  %4352 = vst [vmem:[#allocation86_spill] sm:$0xff] %v3271_v1  ;;  %v3289_v0 = vadd.s32 936, %v2938_v3  ;;  %v3292_v1 = vadd.s32 944, %v2938_v3 }
  0x87   :  { %4353 = vst [vmem:[#allocation87_spill] sm:$0xff] %v3274_v2  ;;  %4354 = vst [vmem:[#allocation88_spill] sm:$0xff] %v3277_v34  ;;  %v3295_v2 = vadd.s32 952, %v2938_v3  ;;  %v3298_v34 = vadd.s32 960, %v2938_v3 }
  0x88   :  { %4355 = vst [vmem:[#allocation89_spill] sm:$0xff] %v3280_v33  ;;  %4356 = vst [vmem:[#allocation90_spill] sm:$0xff] %v3283_v32  ;;  %v3301_v33 = vadd.s32 968, %v2938_v3  ;;  %v3304_v32 = vadd.s32 976, %v2938_v3  ;;  %1899 = sbr.rel (%p1903_p9) target bundleno = 658 (0x292), region = 43 }
  0x89   :  { %4357 = vst [vmem:[#allocation91_spill] sm:$0xff] %v3286_v63  ;;  %4358 = vst [vmem:[#allocation92_spill] sm:$0xff] %v3289_v0  ;;  %v3307_v63 = vadd.s32 984, %v2938_v3  ;;  %v3310_v0 = vadd.s32 992, %v2938_v3 }
  0x8a   :  { %4359 = vst [vmem:[#allocation93_spill] sm:$0xff] %v3292_v1  ;;  %4360 = vst [vmem:[#allocation94_spill] sm:$0xff] %v3295_v2  ;;  %v3313_v1 = vadd.s32 1000, %v2938_v3  ;;  %v3316_v2 = vadd.s32 1008, %v2938_v3 }
  0x8b   :  { %4361 = vst [vmem:[#allocation95_spill] sm:$0xff] %v3298_v34  ;;  %4362 = vst [vmem:[#allocation96_spill] sm:$0xff] %v3304_v32  ;;  %v3319_v34 = vadd.s32 1016, %v2938_v3 }
  0x8c   :  { %4363 = vst [vmem:[#allocation97_spill] sm:$0xff] %v3307_v63  ;;  %4364 = vst [vmem:[#allocation98_spill] sm:$0xff] %v3310_v0 }
  0x8d   :  { %4365 = vst [vmem:[#allocation99_spill] sm:$0xff] %v3313_v1  ;;  %4366 = vst [vmem:[#allocation100_spill] sm:$0xff] %v3316_v2 }
  0x8e   :  { %4367 = vst [vmem:[#allocation101_spill] sm:$0xff] %v3319_v34 }
  0x8f LB: > { %v4368_v23 = vld [vmem:[#allocation31_spill] sm:$0xff]  ;;  %v4369_v22 = vld [vmem:[#allocation30_spill] sm:$0xff]  ;;  %v4370_v21 = vld [vmem:[#allocation29_spill] sm:$0xff]  ;;  %s1905_s13 = sshll.u32 %s2746_s12, 8  ;;  %s430_s12 = sadd.s32 1, %s2746_s12   ;;  %s2746_s12 = sphi %s3325_s12, %s430_s12  }
  0x90   : > { %v4371_v20 = vld [vmem:[#allocation28_spill] sm:$0xff]  ;;  %v4372_v19 = vld [vmem:[#allocation27_spill] sm:$0xff]  ;;  %v4373_v18 = vld [vmem:[#allocation26_spill] sm:$0xff]  ;;  %s434_s14 = sadd.s32 %s1905_s13, %s2871_s9  ;;  %p429_p10 = scmp.ge.s32.totalorder %s430_s12, %s4114_s1 }
  0x91   : > { %v4374_v17 = vld [vmem:[#allocation25_spill] sm:$0xff]  ;;  %v4375_v16 = vld [vmem:[#allocation24_spill] sm:$0xff]  ;;  %v4376_v15 = vld [vmem:[#allocation23_spill] sm:$0xff]  ;;  %s435_s15 = sshra.s32 %s434_s14, 7 }
  0x92   : > { %v4377_v14 = vld [vmem:[#allocation22_spill] sm:$0xff]  ;;  %v4378_v13 = vld [vmem:[#allocation21_spill] sm:$0xff]  ;;  %v4379_v12 = vld [vmem:[#allocation20_spill] sm:$0xff]  ;;  %s455_s18 = scalar_lea.vmem %s4115_s2, %s435_s15  ;;  %s1906_s19 = sshll.u32 %s435_s15, 3 }
  0x93   : > { %v4380_v11 = vld [vmem:[#allocation19_spill] sm:$0xff]  ;;  %v4381_v10 = vld [vmem:[#allocation18_spill] sm:$0xff]  ;;  %v4382_v9 = vld [vmem:[#allocation17_spill] sm:$0xff]  ;;  %s3341_s20 = scalar_lea.vmem [#allocation5], %s1906_s19 }
  0x94   : > { %v4383_v8 = vld [vmem:[#allocation16_spill] sm:$0xff]  ;;  %v4384_v7 = vld [vmem:[#allocation15_spill] sm:$0xff]  ;;  %v4385_v6 = vld [vmem:[#allocation14_spill] sm:$0xff] }
  0x95   : > { %v4386_v5 = vld [vmem:[#allocation13_spill] sm:$0xff]  ;;  %v4387_v4 = vld [vmem:[#allocation12_spill] sm:$0xff]  ;;  %v4388_v3 = vld [vmem:[#allocation11_spill] sm:$0xff] }
  0x96   : > { %v463_v2 = vsub.s32 1, %v4388_v3  ;;  %v459_v34 = vsub.s32 0, %v4388_v3  ;;  %v456_v1 = vld [vmem:[%s455_s18] sm:$0x3]  ;;  %v3344_v32 = vld [vmem:[%s3341_s20 + $0x8] sm:$0xff] }
  0x97   : > { %1361 = vmatprep.mubr.f32.mxu0 %v3344_v32  ;;  %1474 = vmatprep.mubr.f32.mxu1 %v3344_v32 }
  0x98   : > { %v3337_v0 = vrot.slane %v456_v1, %v463_v2  ;;  %v3339_v63 = vrot.slane %v456_v1, %v459_v34  ;;  %v4202_v34 = vmov 1.0|1.0   ;;  %v4389_v1 = vld [vmem:[#allocation32_spill] sm:$0xff]  ;;  %v4390_v2 = vld [vmem:[#allocation35_spill] sm:$0xff] }
  0x9a   : > { %vm466_vm0 = vcmp.eq.s32.totalorder %v3337_v0, %v4388_v3  ;;  %vm468_vm1 = vcmp.eq.s32.totalorder %v3337_v0, %v4387_v4  ;;  %vm530_vm2 = vcmp.eq.s32.totalorder %v3337_v0, %v3034_v35  ;;  %vm532_vm3 = vcmp.eq.s32.totalorder %v3337_v0, %v3037_v36 }
  0x9b   : > { %vm2419_vm4 = vmpackc.low %vm468_vm1, %vm466_vm0  ;;  %vm465_vm5 = vcmp.eq.s32.totalorder %v3339_v63, %v4388_v3  ;;  %vm467_vm6 = vcmp.eq.s32.totalorder %v3339_v63, %v4387_v4  ;;  %vm529_vm7 = vcmp.eq.s32.totalorder %v3339_v63, %v3034_v35  ;;  %vm531_vm8 = vcmp.eq.s32.totalorder %v3339_v63, %v3037_v36  ;;  %v4391_v3 = vld [vmem:[#allocation36_spill] sm:$0xff]  ;;  %v4392_v4 = vld [vmem:[#allocation33_spill] sm:$0xff] }
  0x9c   : > { %2420 = vmatprep.subr.msk.bf16.mxu0 %vm2419_vm4, %v4202_v34  ;;  %vm2483_vm9 = vmpackc.low %vm532_vm3, %vm530_vm2  ;;  %vm470_vm10 = vcmp.eq.s32.totalorder %v3337_v0, %v4386_v5  ;;  %vm472_vm11 = vcmp.eq.s32.totalorder %v3337_v0, %v4385_v6  ;;  %vm534_vm13 = vcmp.eq.s32.totalorder %v3337_v0, %v3040_v37  ;;  %vm536_vm14 = vcmp.eq.s32.totalorder %v3337_v0, %v3043_v38 }
  0x9d   : > { %2484 = vmatprep.subr.msk.bf16.mxu1 %vm2483_vm9, %v4202_v34  ;;  %vm2421_vm12 = vmpackc.low %vm467_vm6, %vm465_vm5  ;;  %vm469_vm1 = vcmp.eq.s32.totalorder %v3339_v63, %v4386_v5  ;;  %vm471_vm2 = vcmp.eq.s32.totalorder %v3339_v63, %v4385_v6  ;;  %vm533_vm4 = vcmp.eq.s32.totalorder %v3339_v63, %v3040_v37  ;;  %vm535_vm5 = vcmp.eq.s32.totalorder %v3339_v63, %v3043_v38  ;;  %v4393_v5 = vld [vmem:[#allocation34_spill] sm:$0xff]  ;;  %v4394_v6 = vld [vmem:[#allocation37_spill] sm:$0xff] }
  0x9e   : > { %2422 = vmatpush1.bf16.xpose.msk.msra.mxu0 %vm2421_vm12, %v4202_v34  ;;  %vm2485_vm15 = vmpackc.low %vm531_vm8, %vm529_vm7  ;;  %vm474_vm6 = vcmp.eq.s32.totalorder %v3337_v0, %v4384_v7  ;;  %vm476_vm7 = vcmp.eq.s32.totalorder %v3337_v0, %v4383_v8  ;;  %vm538_vm9 = vcmp.eq.s32.totalorder %v3337_v0, %v3046_v39 }
  0x9f   : > { %2486 = vmatpush1.bf16.xpose.msk.msra.mxu1 %vm2485_vm15, %v4202_v34  ;;  %vm2423_vm0 = vmpackc.low %vm472_vm11, %vm470_vm10  ;;  %vm540_vm10 = vcmp.eq.s32.totalorder %v3337_v0, %v3049_v40  ;;  %vm475_vm15 = vcmp.eq.s32.totalorder %v3339_v63, %v4383_v8  ;;  %v3713_v8 = vld [vmem:[%s3341_s20 + $0x28] sm:$0xff] }
  0xa0   : > { %2424 = vmatprep.subr.msk.bf16.mxu0 %vm2423_vm0, %v4202_v34  ;;  %vm2487_vm3 = vmpackc.low %vm536_vm14, %vm534_vm13  ;;  %vm473_vm14 = vcmp.eq.s32.totalorder %v3339_v63, %v4384_v7  ;;  %vm537_vm0 = vcmp.eq.s32.totalorder %v3339_v63, %v3046_v39  ;;  %v4395_v7 = vld [vmem:[#allocation38_spill] sm:$0xff] }
  0xa1   : > { %2488 = vmatprep.subr.msk.bf16.mxu1 %vm2487_vm3, %v4202_v34  ;;  %vm2425_vm8 = vmpackc.low %vm471_vm2, %vm469_vm1  ;;  %vm539_vm1 = vcmp.eq.s32.totalorder %v3339_v63, %v3049_v40  ;;  %vm478_vm2 = vcmp.eq.s32.totalorder %v3337_v0, %v4382_v9  ;;  %vm480_vm3 = vcmp.eq.s32.totalorder %v3337_v0, %v4381_v10 }
  0xa2   : > { %vm2489_vm11 = vmpackc.low %vm535_vm5, %vm533_vm4  ;;  %vm542_vm5 = vcmp.eq.s32.totalorder %v3337_v0, %v3052_v41 }
  0xa3   : > { %vm2427_vm12 = vmpackc.low %vm476_vm7, %vm474_vm6  ;;  %vm544_vm6 = vcmp.eq.s32.totalorder %v3337_v0, %v3055_v42 }
  0xa4   : > { %vm2491_vm13 = vmpackc.low %vm540_vm10, %vm538_vm9  ;;  %vm477_vm10 = vcmp.eq.s32.totalorder %v3339_v63, %v4382_v9  ;;  %v4405_v9 = vld [vmem:[#allocation43_spill] sm:$0xff] }
  0xa5   : > { %vm2429_vm4 = vmpackc.low %vm475_vm15, %vm473_vm14  ;;  %vm482_vm14 = vcmp.eq.s32.totalorder %v3337_v0, %v4380_v11  ;;  %vm484_vm15 = vcmp.eq.s32.totalorder %v3337_v0, %v4379_v12 }
  0xa6   : > { %2426 = vmatpush1.bf16.xpose.msk.msra.mxu0 %vm2425_vm8, %v4202_v34  ;;  %vm2493_vm7 = vmpackc.low %vm539_vm1, %vm537_vm0  ;;  %vm546_vm1 = vcmp.eq.s32.totalorder %v3337_v0, %v3058_v43 }
  0xa7   : > { %2490 = vmatpush1.bf16.xpose.msk.msra.mxu1 %vm2489_vm11, %v4202_v34  ;;  %2428 = vmatprep.subr.msk.bf16.mxu0 %vm2427_vm12, %v4202_v34  ;;  %vm2431_vm8 = vmpackc.low %vm480_vm3, %vm478_vm2  ;;  %vm479_vm11 = vcmp.eq.s32.totalorder %v3339_v63, %v4381_v10  ;;  %vm541_vm12 = vcmp.eq.s32.totalorder %v3339_v63, %v3052_v41  ;;  %vm548_vm2 = vcmp.eq.s32.totalorder %v3337_v0, %v3061_v44  ;;  %v3734_v10 = vld [vmem:[%s3341_s20 + $0x20] sm:$0xff] }
  0xa8   : > { %2492 = vmatprep.subr.msk.bf16.mxu1 %vm2491_vm13, %v4202_v34  ;;  %vm2495_vm9 = vmpackc.low %vm544_vm6, %vm542_vm5  ;;  %vm543_vm13 = vcmp.eq.s32.totalorder %v3339_v63, %v3055_v42  ;;  %vm481_vm6 = vcmp.eq.s32.totalorder %v3339_v63, %v4380_v11  ;;  %v3739_v11 = vld [vmem:[%s3341_s20 + $0x38] sm:$0xff] }
  0xa9   : > { %vm2433_vm0 = vmpackc.low %vm479_vm11, %vm477_vm10  ;;  %vm486_vm10 = vcmp.eq.s32.totalorder %v3337_v0, %v4378_v13  ;;  %vm488_vm11 = vcmp.eq.s32.totalorder %v3337_v0, %v4377_v14 }
  0xaa   : > { %vm2497_vm3 = vmpackc.low %vm543_vm13, %vm541_vm12  ;;  %vm550_vm13 = vcmp.eq.s32.totalorder %v3337_v0, %v3064_v45 }
  0xab   : > { %vm2499_vm5 = vmpackc.low %vm548_vm2, %vm546_vm1  ;;  %vm485_vm2 = vcmp.eq.s32.totalorder %v3339_v63, %v4378_v13  ;;  %v3753_v13 = vld [vmem:[%s3341_s20 + $0x48] sm:$0xff] }
  0xae   : > { %2430 = vmatpush1.bf16.xpose.msk.msra.mxu0 %vm2429_vm4, %v4202_v34  ;;  %vm2435_vm4 = vmpackc.low %vm484_vm15, %vm482_vm14  ;;  %vm552_vm14 = vcmp.eq.s32.totalorder %v3337_v0, %v3067_v46 }
  0xaf   : > { %2494 = vmatpush1.bf16.xpose.msk.msra.mxu1 %vm2493_vm7, %v4202_v34  ;;  %2432 = vmatprep.subr.msk.bf16.mxu0 %vm2431_vm8, %v4202_v34  ;;  %vm483_vm7 = vcmp.eq.s32.totalorder %v3339_v63, %v4379_v12  ;;  %vm545_vm8 = vcmp.eq.s32.totalorder %v3339_v63, %v3058_v43  ;;  %vm2503_vm1 = vmpackc.low %vm552_vm14, %vm550_vm13  ;;  %vm489_vm14 = vcmp.eq.s32.totalorder %v3339_v63, %v4376_v15  ;;  %v3744_v12 = vld [vmem:[%s3341_s20 + $0x30] sm:$0xff] }
  0xb0   : > { %2496 = vmatprep.subr.msk.bf16.mxu1 %vm2495_vm9, %v4202_v34  ;;  %vm547_vm9 = vcmp.eq.s32.totalorder %v3339_v63, %v3061_v44  ;;  %vm2437_vm12 = vmpackc.low %vm483_vm7, %vm481_vm6  ;;  %vm490_vm6 = vcmp.eq.s32.totalorder %v3337_v0, %v4376_v15  ;;  %vm492_vm7 = vcmp.eq.s32.totalorder %v3337_v0, %v4375_v16  ;;  %v3779_v15 = vld [vmem:[%s3341_s20 + $0x58] sm:$0xff] }
  0xb1   : > { %vm2501_vm15 = vmpackc.low %vm547_vm9, %vm545_vm8  ;;  %vm554_vm9 = vcmp.eq.s32.totalorder %v3337_v0, %v3070_v47 }
  0xb6   : > { %2434 = vmatpush1.bf16.xpose.msk.msra.mxu0 %vm2433_vm0, %v4202_v34  ;;  %vm2439_vm0 = vmpackc.low %vm488_vm11, %vm486_vm10  ;;  %vm556_vm10 = vcmp.eq.s32.totalorder %v3337_v0, %v3073_v48 }
  0xb7   : > { %2498 = vmatpush1.bf16.xpose.msk.msra.mxu1 %vm2497_vm3, %v4202_v34  ;;  %2436 = vmatprep.subr.msk.bf16.mxu0 %vm2435_vm4, %v4202_v34  ;;  %vm487_vm3 = vcmp.eq.s32.totalorder %v3339_v63, %v4377_v14  ;;  %vm549_vm4 = vcmp.eq.s32.totalorder %v3339_v63, %v3064_v45  ;;  %vm2507_vm13 = vmpackc.low %vm556_vm10, %vm554_vm9  ;;  %vm493_vm10 = vcmp.eq.s32.totalorder %v3339_v63, %v4374_v17  ;;  %v4409_v14 = vld [vmem:[#allocation45_spill] sm:$0xff] }
  0xb8   : > { %2500 = vmatprep.subr.msk.bf16.mxu1 %vm2499_vm5, %v4202_v34  ;;  %vm551_vm5 = vcmp.eq.s32.totalorder %v3339_v63, %v3067_v46  ;;  %vm2441_vm8 = vmpackc.low %vm487_vm3, %vm485_vm2  ;;  %vm494_vm2 = vcmp.eq.s32.totalorder %v3337_v0, %v4374_v17  ;;  %vm496_vm3 = vcmp.eq.s32.totalorder %v3337_v0, %v4373_v18  ;;  %v3793_v17 = vld [vmem:[%s3341_s20 + $0x68] sm:$0xff] }
  0xb9   : > { %vm2505_vm11 = vmpackc.low %vm551_vm5, %vm549_vm4  ;;  %vm558_vm5 = vcmp.eq.s32.totalorder %v3337_v0, %v3076_v49 }
  0xbe   : > { %2438 = vmatpush1.bf16.xpose.msk.msra.mxu0 %vm2437_vm12, %v4202_v34  ;;  %vm2443_vm12 = vmpackc.low %vm492_vm7, %vm490_vm6  ;;  %vm560_vm6 = vcmp.eq.s32.totalorder %v3337_v0, %v3079_v50 }
  0xbf   : > { %2502 = vmatpush1.bf16.xpose.msk.msra.mxu1 %vm2501_vm15, %v4202_v34  ;;  %2440 = vmatprep.subr.msk.bf16.mxu0 %vm2439_vm0, %v4202_v34  ;;  %vm491_vm15 = vcmp.eq.s32.totalorder %v3339_v63, %v4375_v16  ;;  %vm553_vm0 = vcmp.eq.s32.totalorder %v3339_v63, %v3070_v47  ;;  %vm2511_vm9 = vmpackc.low %vm560_vm6, %vm558_vm5  ;;  %vm497_vm6 = vcmp.eq.s32.totalorder %v3339_v63, %v4372_v19  ;;  %v3784_v16 = vld [vmem:[%s3341_s20 + $0x50] sm:$0xff] }
  0xc0   : > { %2504 = vmatprep.subr.msk.bf16.mxu1 %vm2503_vm1, %v4202_v34  ;;  %vm555_vm1 = vcmp.eq.s32.totalorder %v3339_v63, %v3073_v48  ;;  %vm2445_vm4 = vmpackc.low %vm491_vm15, %vm489_vm14  ;;  %vm498_vm14 = vcmp.eq.s32.totalorder %v3337_v0, %v4372_v19  ;;  %vm500_vm15 = vcmp.eq.s32.totalorder %v3337_v0, %v4371_v20  ;;  %v3819_v19 = vld [vmem:[%s3341_s20 + $0x78] sm:$0xff] }
  0xc1   : > { %vm2509_vm7 = vmpackc.low %vm555_vm1, %vm553_vm0  ;;  %vm562_vm1 = vcmp.eq.s32.totalorder %v3337_v0, %v3082_v51 }
  0xc6   : > { %2442 = vmatpush1.bf16.xpose.msk.msra.mxu0 %vm2441_vm8, %v4202_v34  ;;  %vm2447_vm8 = vmpackc.low %vm496_vm3, %vm494_vm2  ;;  %vm564_vm2 = vcmp.eq.s32.totalorder %v3337_v0, %v3085_v52 }
  0xc7   : > { %2506 = vmatpush1.bf16.xpose.msk.msra.mxu1 %vm2505_vm11, %v4202_v34  ;;  %2444 = vmatprep.subr.msk.bf16.mxu0 %vm2443_vm12, %v4202_v34  ;;  %vm495_vm11 = vcmp.eq.s32.totalorder %v3339_v63, %v4373_v18  ;;  %vm557_vm12 = vcmp.eq.s32.totalorder %v3339_v63, %v3076_v49  ;;  %vm2515_vm5 = vmpackc.low %vm564_vm2, %vm562_vm1  ;;  %vm501_vm2 = vcmp.eq.s32.totalorder %v3339_v63, %v4370_v21  ;;  %v4413_v18 = vld [vmem:[#allocation47_spill] sm:$0xff] }
  0xc8   : > { %2508 = vmatprep.subr.msk.bf16.mxu1 %vm2507_vm13, %v4202_v34  ;;  %vm559_vm13 = vcmp.eq.s32.totalorder %v3339_v63, %v3079_v50  ;;  %vm2449_vm0 = vmpackc.low %vm495_vm11, %vm493_vm10  ;;  %vm502_vm10 = vcmp.eq.s32.totalorder %v3337_v0, %v4370_v21  ;;  %vm504_vm11 = vcmp.eq.s32.totalorder %v3337_v0, %v4369_v22  ;;  %v4417_v21 = vld [vmem:[#allocation49_spill] sm:$0xff] }
  0xc9   : > { %vm2513_vm3 = vmpackc.low %vm559_vm13, %vm557_vm12  ;;  %vm566_vm13 = vcmp.eq.s32.totalorder %v3337_v0, %v3088_v53 }
  0xce   : > { %2446 = vmatpush1.bf16.xpose.msk.msra.mxu0 %vm2445_vm4, %v4202_v34  ;;  %vm2451_vm4 = vmpackc.low %vm500_vm15, %vm498_vm14  ;;  %vm568_vm14 = vcmp.eq.s32.totalorder %v3337_v0, %v3091_v54 }
  0xcf   : > { %2510 = vmatpush1.bf16.xpose.msk.msra.mxu1 %vm2509_vm7, %v4202_v34  ;;  %2448 = vmatprep.subr.msk.bf16.mxu0 %vm2447_vm8, %v4202_v34  ;;  %vm499_vm7 = vcmp.eq.s32.totalorder %v3339_v63, %v4371_v20  ;;  %vm561_vm8 = vcmp.eq.s32.totalorder %v3339_v63, %v3082_v51  ;;  %vm2519_vm1 = vmpackc.low %vm568_vm14, %vm566_vm13  ;;  %vm505_vm14 = vcmp.eq.s32.totalorder %v3339_v63, %v4368_v23  ;;  %v3824_v20 = vld [vmem:[%s3341_s20 + $0x70] sm:$0xff] }
  0xd0   : > { %2512 = vmatprep.subr.msk.bf16.mxu1 %vm2511_vm9, %v4202_v34  ;;  %vm563_vm9 = vcmp.eq.s32.totalorder %v3339_v63, %v3085_v52  ;;  %vm2453_vm12 = vmpackc.low %vm499_vm7, %vm497_vm6  ;;  %vm506_vm6 = vcmp.eq.s32.totalorder %v3337_v0, %v4368_v23  ;;  %vm508_vm7 = vcmp.eq.s32.totalorder %v3337_v0, %v3001_v24  ;;  %v4428_v23 = vld [vmem:[#allocation86_spill] sm:$0xff] }
  0xd1   : > { %vm2517_vm15 = vmpackc.low %vm563_vm9, %vm561_vm8  ;;  %vm570_vm9 = vcmp.eq.s32.totalorder %v3337_v0, %v3094_v55 }
  0xd6   : > { %2450 = vmatpush1.bf16.xpose.msk.msra.mxu0 %vm2449_vm0, %v4202_v34  ;;  %vm2455_vm0 = vmpackc.low %vm504_vm11, %vm502_vm10  ;;  %vm572_vm10 = vcmp.eq.s32.totalorder %v3337_v0, %v3097_v56 }
  0xd7   : > { %2514 = vmatpush1.bf16.xpose.msk.msra.mxu1 %vm2513_vm3, %v4202_v34  ;;  %2452 = vmatprep.subr.msk.bf16.mxu0 %vm2451_vm4, %v4202_v34  ;;  %vm503_vm3 = vcmp.eq.s32.totalorder %v3339_v63, %v4369_v22  ;;  %vm565_vm4 = vcmp.eq.s32.totalorder %v3339_v63, %v3088_v53  ;;  %vm2523_vm13 = vmpackc.low %vm572_vm10, %vm570_vm9  ;;  %vm509_vm10 = vcmp.eq.s32.totalorder %v3339_v63, %v3004_v25  ;;  %v4418_v22 = vld [vmem:[#allocation50_spill] sm:$0xff] }
  0xd8   : > { %2516 = vmatprep.subr.msk.bf16.mxu1 %vm2515_vm5, %v4202_v34  ;;  %vm567_vm5 = vcmp.eq.s32.totalorder %v3339_v63, %v3091_v54  ;;  %vm2457_vm8 = vmpackc.low %vm503_vm3, %vm501_vm2  ;;  %vm510_vm2 = vcmp.eq.s32.totalorder %v3337_v0, %v3004_v25  ;;  %vm512_vm3 = vcmp.eq.s32.totalorder %v3337_v0, %v3007_v26 }
  0xd9   : > { %vm2521_vm11 = vmpackc.low %vm567_vm5, %vm565_vm4  ;;  %vm574_vm5 = vcmp.eq.s32.totalorder %v3337_v0, %v3100_v57 }
  0xde   : > { %2454 = vmatpush1.bf16.xpose.msk.msra.mxu0 %vm2453_vm12, %v4202_v34  ;;  %vm2459_vm12 = vmpackc.low %vm508_vm7, %vm506_vm6  ;;  %vm576_vm6 = vcmp.eq.s32.totalorder %v3337_v0, %v3103_v58 }
  0xdf   : > { %2518 = vmatpush1.bf16.xpose.msk.msra.mxu1 %vm2517_vm15, %v4202_v34  ;;  %2456 = vmatprep.subr.msk.bf16.mxu0 %vm2455_vm0, %v4202_v34  ;;  %vm507_vm15 = vcmp.eq.s32.totalorder %v3339_v63, %v3001_v24  ;;  %vm569_vm0 = vcmp.eq.s32.totalorder %v3339_v63, %v3094_v55  ;;  %vm2527_vm9 = vmpackc.low %vm576_vm6, %vm574_vm5  ;;  %vm513_vm6 = vcmp.eq.s32.totalorder %v3339_v63, %v3010_v27 }
  0xe0   : > { %2520 = vmatprep.subr.msk.bf16.mxu1 %vm2519_vm1, %v4202_v34  ;;  %vm571_vm1 = vcmp.eq.s32.totalorder %v3339_v63, %v3097_v56  ;;  %vm2461_vm4 = vmpackc.low %vm507_vm15, %vm505_vm14  ;;  %vm514_vm14 = vcmp.eq.s32.totalorder %v3337_v0, %v3010_v27  ;;  %vm516_vm15 = vcmp.eq.s32.totalorder %v3337_v0, %v3013_v28 }
  0xe1   : > { %vm2525_vm7 = vmpackc.low %vm571_vm1, %vm569_vm0  ;;  %vm578_vm1 = vcmp.eq.s32.totalorder %v3337_v0, %v3106_v59 }
  0xe6   : > { %2458 = vmatpush1.bf16.xpose.msk.msra.mxu0 %vm2457_vm8, %v4202_v34  ;;  %vm2463_vm8 = vmpackc.low %vm512_vm3, %vm510_vm2  ;;  %vm580_vm2 = vcmp.eq.s32.totalorder %v3337_v0, %v3109_v60 }
  0xe7   : > { %2522 = vmatpush1.bf16.xpose.msk.msra.mxu1 %vm2521_vm11, %v4202_v34  ;;  %2460 = vmatprep.subr.msk.bf16.mxu0 %vm2459_vm12, %v4202_v34  ;;  %vm511_vm11 = vcmp.eq.s32.totalorder %v3339_v63, %v3007_v26  ;;  %vm573_vm12 = vcmp.eq.s32.totalorder %v3339_v63, %v3100_v57  ;;  %vm2531_vm5 = vmpackc.low %vm580_vm2, %vm578_vm1  ;;  %vm517_vm2 = vcmp.eq.s32.totalorder %v3339_v63, %v3016_v29 }
  0xe8   : > { %2524 = vmatprep.subr.msk.bf16.mxu1 %vm2523_vm13, %v4202_v34  ;;  %vm575_vm13 = vcmp.eq.s32.totalorder %v3339_v63, %v3103_v58  ;;  %vm2465_vm0 = vmpackc.low %vm511_vm11, %vm509_vm10  ;;  %vm518_vm10 = vcmp.eq.s32.totalorder %v3337_v0, %v3016_v29  ;;  %vm520_vm11 = vcmp.eq.s32.totalorder %v3337_v0, %v3019_v30 }
  0xe9   : > { %vm2529_vm3 = vmpackc.low %vm575_vm13, %vm573_vm12  ;;  %vm582_vm13 = vcmp.eq.s32.totalorder %v3337_v0, %v3112_v61 }
  0xee   : > { %2462 = vmatpush1.bf16.xpose.msk.msra.mxu0 %vm2461_vm4, %v4202_v34  ;;  %vm2467_vm4 = vmpackc.low %vm516_vm15, %vm514_vm14  ;;  %vm584_vm14 = vcmp.eq.s32.totalorder %v3337_v0, %v3115_v62 }
  0xef   : > { %2526 = vmatpush1.bf16.xpose.msk.msra.mxu1 %vm2525_vm7, %v4202_v34  ;;  %2464 = vmatprep.subr.msk.bf16.mxu0 %vm2463_vm8, %v4202_v34  ;;  %vm515_vm7 = vcmp.eq.s32.totalorder %v3339_v63, %v3013_v28  ;;  %vm577_vm8 = vcmp.eq.s32.totalorder %v3339_v63, %v3106_v59  ;;  %vm2535_vm1 = vmpackc.low %vm584_vm14, %vm582_vm13  ;;  %vm521_vm14 = vcmp.eq.s32.totalorder %v3339_v63, %v3022_v31 }
  0xf0   : > { %2528 = vmatprep.subr.msk.bf16.mxu1 %vm2527_vm9, %v4202_v34  ;;  %vm579_vm9 = vcmp.eq.s32.totalorder %v3339_v63, %v3109_v60  ;;  %vm2469_vm12 = vmpackc.low %vm515_vm7, %vm513_vm6  ;;  %vm522_vm6 = vcmp.eq.s32.totalorder %v3337_v0, %v3022_v31  ;;  %vm524_vm7 = vcmp.eq.s32.totalorder %v3337_v0, %v4389_v1 }
  0xf1   : > { %vm2533_vm15 = vmpackc.low %vm579_vm9, %vm577_vm8  ;;  %vm586_vm9 = vcmp.eq.s32.totalorder %v3337_v0, %v4390_v2 }
  0xf6   : > { %2466 = vmatpush1.bf16.xpose.msk.msra.mxu0 %vm2465_vm0, %v4202_v34  ;;  %vm2471_vm0 = vmpackc.low %vm520_vm11, %vm518_vm10  ;;  %vm588_vm10 = vcmp.eq.s32.totalorder %v3337_v0, %v4391_v3 }
  0xf7   : > { %2530 = vmatpush1.bf16.xpose.msk.msra.mxu1 %vm2529_vm3, %v4202_v34  ;;  %2468 = vmatprep.subr.msk.bf16.mxu0 %vm2467_vm4, %v4202_v34  ;;  %vm519_vm3 = vcmp.eq.s32.totalorder %v3339_v63, %v3019_v30  ;;  %vm581_vm4 = vcmp.eq.s32.totalorder %v3339_v63, %v3112_v61  ;;  %vm2539_vm13 = vmpackc.low %vm588_vm10, %vm586_vm9  ;;  %vm525_vm10 = vcmp.eq.s32.totalorder %v3339_v63, %v4392_v4 }
  0xf8   : > { %2532 = vmatprep.subr.msk.bf16.mxu1 %vm2531_vm5, %v4202_v34  ;;  %vm583_vm5 = vcmp.eq.s32.totalorder %v3339_v63, %v3115_v62  ;;  %vm2473_vm8 = vmpackc.low %vm519_vm3, %vm517_vm2  ;;  %vm526_vm2 = vcmp.eq.s32.totalorder %v3337_v0, %v4392_v4  ;;  %vm528_vm3 = vcmp.eq.s32.totalorder %v3337_v0, %v4393_v5  ;;  %v4399_v4 = vld [vmem:[#allocation72_spill] sm:$0xff] }
  0xf9   : > { %vm2537_vm11 = vmpackc.low %vm583_vm5, %vm581_vm4  ;;  %vm590_vm5 = vcmp.eq.s32.totalorder %v3337_v0, %v4394_v6 }
  0xfe   : > { %2470 = vmatpush1.bf16.xpose.msk.msra.mxu0 %vm2469_vm12, %v4202_v34  ;;  %vm2475_vm12 = vmpackc.low %vm524_vm7, %vm522_vm6  ;;  %vm592_vm6 = vcmp.eq.s32.totalorder %v3337_v0, %v4395_v7 }
  0xff   : > { %2534 = vmatpush1.bf16.xpose.msk.msra.mxu1 %vm2533_vm15, %v4202_v34  ;;  %2472 = vmatprep.subr.msk.bf16.mxu0 %vm2471_vm0, %v4202_v34  ;;  %vm523_vm15 = vcmp.eq.s32.totalorder %v3339_v63, %v4389_v1  ;;  %vm585_vm0 = vcmp.eq.s32.totalorder %v3339_v63, %v4390_v2  ;;  %vm2543_vm9 = vmpackc.low %vm592_vm6, %vm590_vm5  ;;  %v4396_v1 = vld [vmem:[#allocation39_spill] sm:$0xff]  ;;  %v4397_v2 = vld [vmem:[#allocation40_spill] sm:$0xff] }
 0x100   : > { %2536 = vmatprep.subr.msk.bf16.mxu1 %vm2535_vm1, %v4202_v34  ;;  %vm587_vm1 = vcmp.eq.s32.totalorder %v3339_v63, %v4391_v3  ;;  %vm2477_vm4 = vmpackc.low %vm523_vm15, %vm521_vm14  ;;  %vm594_vm14 = vcmp.eq.s32.totalorder %v3337_v0, %v4396_v1  ;;  %vm596_vm15 = vcmp.eq.s32.totalorder %v3337_v0, %v4397_v2  ;;  %v4398_v3 = vld [vmem:[#allocation71_spill] sm:$0xff]  ;;  %vm593_vm6 = vcmp.eq.s32.totalorder %v3339_v63, %v4396_v1  ;;  %v4402_v1 = vld [vmem:[#allocation73_spill] sm:$0xff] }
 0x101   : > { %vm2541_vm7 = vmpackc.low %vm587_vm1, %vm585_vm0  ;;  %vm658_vm1 = vcmp.eq.s32.totalorder %v3337_v0, %v4398_v3 }
 0x106   : > { %2474 = vmatpush1.bf16.xpose.msk.msra.mxu0 %vm2473_vm8, %v4202_v34  ;;  %vm2479_vm8 = vmpackc.low %vm528_vm3, %vm526_vm2  ;;  %vm660_vm2 = vcmp.eq.s32.totalorder %v3337_v0, %v4399_v4 }
 0x107   : > { %2538 = vmatpush1.bf16.xpose.msk.msra.mxu1 %vm2537_vm11, %v4202_v34  ;;  %2476 = vmatprep.subr.msk.bf16.mxu0 %vm2475_vm12, %v4202_v34  ;;  %vm527_vm11 = vcmp.eq.s32.totalorder %v3339_v63, %v4393_v5  ;;  %vm589_vm12 = vcmp.eq.s32.totalorder %v3339_v63, %v4394_v6  ;;  %vm2611_vm5 = vmpackc.low %vm660_vm2, %vm658_vm1  ;;  %v4400_v5 = vld [vmem:[#allocation41_spill] sm:$0xff]  ;;  %v4401_v6 = vld [vmem:[#allocation42_spill] sm:$0xff] }
 0x108   : > { %2540 = vmatprep.subr.msk.bf16.mxu1 %vm2539_vm13, %v4202_v34  ;;  %vm591_vm13 = vcmp.eq.s32.totalorder %v3339_v63, %v4395_v7  ;;  %vm2481_vm0 = vmpackc.low %vm527_vm11, %vm525_vm10  ;;  %vm598_vm10 = vcmp.eq.s32.totalorder %v3337_v0, %v4400_v5  ;;  %vm600_vm11 = vcmp.eq.s32.totalorder %v3337_v0, %v4401_v6  ;;  %v3691_v7 = vld [vmem:[%s3341_s20] sm:$0xff]  ;;  %vm597_vm2 = vcmp.eq.s32.totalorder %v3339_v63, %v4400_v5  ;;  %v4406_v5 = vld [vmem:[#allocation44_spill] sm:$0xff] }
 0x109   : > { %vm2545_vm3 = vmpackc.low %vm591_vm13, %vm589_vm12  ;;  %vm662_vm13 = vcmp.eq.s32.totalorder %v3337_v0, %v4402_v1 }
 0x10e   : > { %2478 = vmatpush1.bf16.xpose.msk.msra.mxu0 %vm2477_vm4, %v4202_v34  ;;  %vm2547_vm4 = vmpackc.low %vm596_vm15, %vm594_vm14 }
 0x10f   : > { %2542 = vmatpush1.bf16.xpose.msk.msra.mxu1 %vm2541_vm7, %v4202_v34  ;;  %2480 = vmatprep.subr.msk.bf16.mxu0 %vm2479_vm8, %v4202_v34  ;;  %vm595_vm7 = vcmp.eq.s32.totalorder %v3339_v63, %v4397_v2  ;;  %vm657_vm8 = vcmp.eq.s32.totalorder %v3339_v63, %v4398_v3  ;;  %v3699_v2 = vld [vmem:[%s3341_s20 + $0x18] sm:$0xff]  ;;  %v4404_v3 = vmov 1.0|1.0  }
 0x110   : > { %2544 = vmatprep.subr.msk.bf16.mxu1 %vm2543_vm9, %v4202_v34  ;;  %vm659_vm9 = vcmp.eq.s32.totalorder %v3339_v63, %v4399_v4  ;;  %vm2549_vm12 = vmpackc.low %vm595_vm7, %vm593_vm6  ;;  %v3704_v4 = vld [vmem:[%s3341_s20 + $0x10] sm:$0xff]  ;;  %vm602_vm6 = vcmp.eq.s32.totalorder %v3337_v0, %v4405_v9  ;;  %vm604_vm7 = vcmp.eq.s32.totalorder %v3337_v0, %v4406_v5 }
 0x111   : > { %vm2613_vm15 = vmpackc.low %vm659_vm9, %vm657_vm8 }
 0x116   : > { %2482 = vmatpush1.bf16.xpose.msk.msra.mxu0 %vm2481_vm0, %v4202_v34  ;;  %vm2551_vm0 = vmpackc.low %vm600_vm11, %vm598_vm10 }
 0x117   : > { %2546 = vmatpush1.bf16.xpose.msk.msra.mxu1 %vm2545_vm3, %v4202_v34  ;;  %2548 = vmatprep.subr.msk.bf16.mxu0 %vm2547_vm4, %v4202_v34  ;;  %vm599_vm3 = vcmp.eq.s32.totalorder %v3339_v63, %v4401_v6  ;;  %vm661_vm4 = vcmp.eq.s32.totalorder %v3339_v63, %v4402_v1  ;;  %v4407_v6 = vld [vmem:[#allocation75_spill] sm:$0xff]  ;;  %v4408_v1 = vld [vmem:[#allocation76_spill] sm:$0xff] }
 0x118   : > { %2612 = vmatprep.subr.msk.bf16.mxu1 %vm2611_vm5, %v4202_v34  ;;  %v4403_v34 = vld [vmem:[#allocation74_spill] sm:$0xff]  ;;  %vm2553_vm8 = vmpackc.low %vm599_vm3, %vm597_vm2  ;;  %vm666_vm9 = vcmp.eq.s32.totalorder %v3337_v0, %v4407_v6  ;;  %vm668_vm10 = vcmp.eq.s32.totalorder %v3337_v0, %v4408_v1  ;;  %vm606_vm2 = vcmp.eq.s32.totalorder %v3337_v0, %v4409_v14 }
 0x119   : > { %vm664_vm14 = vcmp.eq.s32.totalorder %v3337_v0, %v4403_v34  ;;  %vm663_vm5 = vcmp.eq.s32.totalorder %v3339_v63, %v4403_v34 }
 0x11a   : > { %vm2615_vm1 = vmpackc.low %vm664_vm14, %vm662_vm13  ;;  %vm601_vm14 = vcmp.eq.s32.totalorder %v3339_v63, %v4405_v9  ;;  %v4410_v9 = vld [vmem:[#allocation46_spill] sm:$0xff] }
 0x11b   : > { %vm2617_vm11 = vmpackc.low %vm663_vm5, %vm661_vm4  ;;  %vm608_vm3 = vcmp.eq.s32.totalorder %v3337_v0, %v4410_v9 }
 0x11c   : > { %vm2619_vm13 = vmpackc.low %vm668_vm10, %vm666_vm9  ;;  %vm605_vm10 = vcmp.eq.s32.totalorder %v3339_v63, %v4409_v14  ;;  %v4414_v14 = vld [vmem:[#allocation48_spill] sm:$0xff] }
 0x11d   : > { %1362 = vmatmul.mubr.f32.vlgmr.msra.gmra.mrb[0].mxu0 %v3691_v7 }
 0x11e   : > { %1475 = vmatmul.mubr.f32.vlgmr.msra.gmra.mrb[0].mxu1 %v3691_v7  ;;  %2550 = vmatpush1.bf16.xpose.msk.msra.mxu0 %vm2549_vm12, %v4404_v3  ;;  %vm2555_vm12 = vmpackc.low %vm604_vm7, %vm602_vm6 }
 0x11f   : > { %2614 = vmatpush1.bf16.xpose.msk.msra.mxu1 %vm2613_vm15, %v4404_v3  ;;  %2552 = vmatprep.subr.msk.bf16.mxu0 %vm2551_vm0, %v4404_v3  ;;  %vm603_vm15 = vcmp.eq.s32.totalorder %v3339_v63, %v4406_v5  ;;  %vm665_vm0 = vcmp.eq.s32.totalorder %v3339_v63, %v4407_v6  ;;  %v4411_v5 = vld [vmem:[#allocation77_spill] sm:$0xff]  ;;  %v4412_v6 = vld [vmem:[#allocation78_spill] sm:$0xff] }
 0x120   : > { %2616 = vmatprep.subr.msk.bf16.mxu1 %vm2615_vm1, %v4404_v3  ;;  %1367 = vmatprep.mubr.f32.mxu0 %v3699_v2  ;;  %vm667_vm1 = vcmp.eq.s32.totalorder %v3339_v63, %v4408_v1  ;;  %vm2557_vm4 = vmpackc.low %vm603_vm15, %vm601_vm14  ;;  %vm670_vm5 = vcmp.eq.s32.totalorder %v3337_v0, %v4411_v5  ;;  %vm672_vm6 = vcmp.eq.s32.totalorder %v3337_v0, %v4412_v6  ;;  %v3774_v1 = vld [vmem:[%s3341_s20 + $0x40] sm:$0xff] }
 0x121   : > { %1480 = vmatprep.mubr.f32.mxu1 %v3699_v2  ;;  %1368 = vmatmul.mubr.f32.gmra.mrb[2].mxu0 %v3704_v4  ;;  %vm2621_vm7 = vmpackc.low %vm667_vm1, %vm665_vm0  ;;  %vm610_vm14 = vcmp.eq.s32.totalorder %v3337_v0, %v4413_v18  ;;  %vm612_vm15 = vcmp.eq.s32.totalorder %v3337_v0, %v4414_v14 }
 0x122   : > { %1481 = vmatmul.mubr.f32.gmra.mrb[2].mxu1 %v3704_v4  ;;  %1373 = vmatprep.mubr.f32.mxu0 %v3713_v8  ;;  %vm2623_vm9 = vmpackc.low %vm672_vm6, %vm670_vm5  ;;  %vm609_vm6 = vcmp.eq.s32.totalorder %v3339_v63, %v4413_v18  ;;  %v4423_v18 = vld [vmem:[#allocation83_spill] sm:$0xff] }
 0x123   : > { %1486 = vmatprep.mubr.f32.mxu1 %v3713_v8 }
 0x125   : > { %1374 = vmatmul.mubr.f32.gmra.mrb[4].mxu0 %v3734_v10 }
 0x126   : > { %2554 = vmatpush1.bf16.xpose.msk.msra.mxu0 %vm2553_vm8, %v4404_v3  ;;  %1487 = vmatmul.mubr.f32.gmra.mrb[4].mxu1 %v3734_v10  ;;  %vm2559_vm8 = vmpackc.low %vm608_vm3, %vm606_vm2 }
 0x127   : > { %2618 = vmatpush1.bf16.xpose.msk.msra.mxu1 %vm2617_vm11, %v4404_v3  ;;  %2556 = vmatprep.subr.msk.bf16.mxu0 %vm2555_vm12, %v4404_v3  ;;  %vm607_vm11 = vcmp.eq.s32.totalorder %v3339_v63, %v4410_v9  ;;  %vm669_vm12 = vcmp.eq.s32.totalorder %v3339_v63, %v4411_v5  ;;  %v4415_v9 = vld [vmem:[#allocation79_spill] sm:$0xff]  ;;  %v4416_v5 = vld [vmem:[#allocation80_spill] sm:$0xff] }
 0x128   : > { %2620 = vmatprep.subr.msk.bf16.mxu1 %vm2619_vm13, %v4404_v3  ;;  %1379 = vmatprep.mubr.f32.mxu0 %v3739_v11  ;;  %vm671_vm13 = vcmp.eq.s32.totalorder %v3339_v63, %v4412_v6  ;;  %vm2561_vm0 = vmpackc.low %vm607_vm11, %vm605_vm10  ;;  %vm674_vm1 = vcmp.eq.s32.totalorder %v3337_v0, %v4415_v9  ;;  %vm676_vm2 = vcmp.eq.s32.totalorder %v3337_v0, %v4416_v5  ;;  %v3814_v6 = vld [vmem:[%s3341_s20 + $0x60] sm:$0xff] }
 0x129   : > { %1492 = vmatprep.mubr.f32.mxu1 %v3739_v11  ;;  %1380 = vmatmul.mubr.f32.gmra.mrb[6].mxu0 %v3744_v12  ;;  %vm2625_vm3 = vmpackc.low %vm671_vm13, %vm669_vm12  ;;  %vm614_vm10 = vcmp.eq.s32.totalorder %v3337_v0, %v4417_v21  ;;  %vm616_vm11 = vcmp.eq.s32.totalorder %v3337_v0, %v4418_v22 }
 0x12a   : > { %1493 = vmatmul.mubr.f32.gmra.mrb[6].mxu1 %v3744_v12  ;;  %1385 = vmatprep.mubr.f32.mxu0 %v3753_v13  ;;  %vm2627_vm5 = vmpackc.low %vm676_vm2, %vm674_vm1  ;;  %vm613_vm2 = vcmp.eq.s32.totalorder %v3339_v63, %v4417_v21  ;;  %v4424_v21 = vld [vmem:[#allocation84_spill] sm:$0xff] }
 0x12b   : > { %1498 = vmatprep.mubr.f32.mxu1 %v3753_v13 }
 0x12d   : > { %1386 = vmatmul.mubr.f32.gmra.mrb[8].mxu0 %v3774_v1 }
 0x12e   : > { %2558 = vmatpush1.bf16.xpose.msk.msra.mxu0 %vm2557_vm4, %v4404_v3  ;;  %1499 = vmatmul.mubr.f32.gmra.mrb[8].mxu1 %v3774_v1  ;;  %vm2563_vm4 = vmpackc.low %vm612_vm15, %vm610_vm14 }
 0x12f   : > { %2622 = vmatpush1.bf16.xpose.msk.msra.mxu1 %vm2621_vm7, %v4404_v3  ;;  %2560 = vmatprep.subr.msk.bf16.mxu0 %vm2559_vm8, %v4404_v3  ;;  %vm611_vm7 = vcmp.eq.s32.totalorder %v3339_v63, %v4414_v14  ;;  %vm673_vm8 = vcmp.eq.s32.totalorder %v3339_v63, %v4415_v9  ;;  %v4419_v14 = vld [vmem:[#allocation81_spill] sm:$0xff]  ;;  %v4420_v9 = vld [vmem:[#allocation82_spill] sm:$0xff] }
 0x130   : > { %2624 = vmatprep.subr.msk.bf16.mxu1 %vm2623_vm9, %v4404_v3  ;;  %1391 = vmatprep.mubr.f32.mxu0 %v3779_v15  ;;  %vm675_vm9 = vcmp.eq.s32.totalorder %v3339_v63, %v4416_v5  ;;  %vm2565_vm12 = vmpackc.low %vm611_vm7, %vm609_vm6  ;;  %vm678_vm13 = vcmp.eq.s32.totalorder %v3337_v0, %v4419_v14  ;;  %vm680_vm14 = vcmp.eq.s32.totalorder %v3337_v0, %v4420_v9  ;;  %v4422_v5 = vld [vmem:[#allocation52_spill] sm:$0xff] }
 0x131   : > { %1504 = vmatprep.mubr.f32.mxu1 %v3779_v15  ;;  %1392 = vmatmul.mubr.f32.gmra.mrb[10].mxu0 %v3784_v16  ;;  %vm2629_vm15 = vmpackc.low %vm675_vm9, %vm673_vm8  ;;  %vm620_vm7 = vcmp.eq.s32.totalorder %v3337_v0, %v4422_v5  ;;  %vm682_vm9 = vcmp.eq.s32.totalorder %v3337_v0, %v4423_v18 }
 0x132   : > { %1505 = vmatmul.mubr.f32.gmra.mrb[10].mxu1 %v3784_v16  ;;  %1397 = vmatprep.mubr.f32.mxu0 %v3793_v17  ;;  %vm2631_vm1 = vmpackc.low %vm680_vm14, %vm678_vm13 }
 0x133   : > { %1510 = vmatprep.mubr.f32.mxu1 %v3793_v17 }
 0x135   : > { %1398 = vmatmul.mubr.f32.gmra.mrb[12].mxu0 %v3814_v6 }
 0x136   : > { %2562 = vmatpush1.bf16.xpose.msk.msra.mxu0 %vm2561_vm0, %v4404_v3  ;;  %1511 = vmatmul.mubr.f32.gmra.mrb[12].mxu1 %v3814_v6  ;;  %vm2567_vm0 = vmpackc.low %vm616_vm11, %vm614_vm10  ;;  %vm684_vm10 = vcmp.eq.s32.totalorder %v3337_v0, %v4424_v21 }
 0x137   : > { %2626 = vmatpush1.bf16.xpose.msk.msra.mxu1 %vm2625_vm3, %v4404_v3  ;;  %2564 = vmatprep.subr.msk.bf16.mxu0 %vm2563_vm4, %v4404_v3  ;;  %vm615_vm3 = vcmp.eq.s32.totalorder %v3339_v63, %v4418_v22  ;;  %vm677_vm4 = vcmp.eq.s32.totalorder %v3339_v63, %v4419_v14  ;;  %vm2635_vm13 = vmpackc.low %vm684_vm10, %vm682_vm9  ;;  %v4426_v14 = vld [vmem:[#allocation54_spill] sm:$0xff]  ;;  %v4427_v22 = vld [vmem:[#allocation85_spill] sm:$0xff] }
 0x138   : > { %2628 = vmatprep.subr.msk.bf16.mxu1 %vm2627_vm5, %v4404_v3  ;;  %1403 = vmatprep.mubr.f32.mxu0 %v3819_v19  ;;  %vm679_vm5 = vcmp.eq.s32.totalorder %v3339_v63, %v4420_v9  ;;  %vm2569_vm8 = vmpackc.low %vm615_vm3, %vm613_vm2  ;;  %v4425_v9 = vld [vmem:[#allocation53_spill] sm:$0xff]  ;;  %vm624_vm3 = vcmp.eq.s32.totalorder %v3337_v0, %v4426_v14 }
 0x139   : > { %1516 = vmatprep.mubr.f32.mxu1 %v3819_v19  ;;  %1404 = vmatmul.mubr.f32.gmra.mrb[14].mxu0 %v3824_v20  ;;  %vm2633_vm11 = vmpackc.low %vm679_vm5, %vm677_vm4  ;;  %vm622_vm2 = vcmp.eq.s32.totalorder %v3337_v0, %v4425_v9  ;;  %vm686_vm5 = vcmp.eq.s32.totalorder %v3337_v0, %v4427_v22  ;;  %vm621_vm10 = vcmp.eq.s32.totalorder %v3339_v63, %v4425_v9  ;;  %v4432_v9 = vld [vmem:[#allocation88_spill] sm:$0xff] }
 0x13a   : > { %1517 = vmatmul.mubr.f32.gmra.mrb[14].mxu1 %v3824_v20  ;;  %1587 = vmatprep.mubr.f32.mxu0 %v3344_v32 }
 0x13b   : > { %1700 = vmatprep.mubr.f32.mxu1 %v3344_v32  ;;  %v4421_v32 = vld [vmem:[#allocation51_spill] sm:$0xff] }
 0x13c   : > { %vm618_vm6 = vcmp.eq.s32.totalorder %v3337_v0, %v4421_v32  ;;  %vm617_vm14 = vcmp.eq.s32.totalorder %v3339_v63, %v4421_v32 }
 0x13e   : > { %2566 = vmatpush1.bf16.xpose.msk.msra.mxu0 %vm2565_vm12, %v4404_v3  ;;  %vm2571_vm12 = vmpackc.low %vm620_vm7, %vm618_vm6  ;;  %vm688_vm6 = vcmp.eq.s32.totalorder %v3337_v0, %v4428_v23 }
 0x13f   : > { %2630 = vmatpush1.bf16.xpose.msk.msra.mxu1 %vm2629_vm15, %v4404_v3  ;;  %2568 = vmatprep.subr.msk.bf16.mxu0 %vm2567_vm0, %v4404_v3  ;;  %vm619_vm15 = vcmp.eq.s32.totalorder %v3339_v63, %v4422_v5  ;;  %vm681_vm0 = vcmp.eq.s32.totalorder %v3339_v63, %v4423_v18  ;;  %vm2639_vm9 = vmpackc.low %vm688_vm6, %vm686_vm5  ;;  %v4429_v5 = vld [vmem:[#allocation55_spill] sm:$0xff]  ;;  %v4430_v18 = vld [vmem:[#allocation56_spill] sm:$0xff] }
 0x140   : > { %2632 = vmatprep.subr.msk.bf16.mxu1 %vm2631_vm1, %v4404_v3  ;;  %vm683_vm1 = vcmp.eq.s32.totalorder %v3339_v63, %v4424_v21  ;;  %vm2573_vm4 = vmpackc.low %vm619_vm15, %vm617_vm14  ;;  %vm626_vm14 = vcmp.eq.s32.totalorder %v3337_v0, %v4429_v5  ;;  %vm628_vm15 = vcmp.eq.s32.totalorder %v3337_v0, %v4430_v18  ;;  %v4431_v21 = vld [vmem:[#allocation87_spill] sm:$0xff]  ;;  %vm625_vm6 = vcmp.eq.s32.totalorder %v3339_v63, %v4429_v5  ;;  %v4436_v5 = vld [vmem:[#allocation90_spill] sm:$0xff] }
 0x141   : > { %vm2637_vm7 = vmpackc.low %vm683_vm1, %vm681_vm0  ;;  %vm690_vm1 = vcmp.eq.s32.totalorder %v3337_v0, %v4431_v21 }
 0x146   : > { %2570 = vmatpush1.bf16.xpose.msk.msra.mxu0 %vm2569_vm8, %v4404_v3  ;;  %vm2575_vm8 = vmpackc.low %vm624_vm3, %vm622_vm2  ;;  %vm692_vm2 = vcmp.eq.s32.totalorder %v3337_v0, %v4432_v9 }
 0x147   : > { %2634 = vmatpush1.bf16.xpose.msk.msra.mxu1 %vm2633_vm11, %v4404_v3  ;;  %2572 = vmatprep.subr.msk.bf16.mxu0 %vm2571_vm12, %v4404_v3  ;;  %vm623_vm11 = vcmp.eq.s32.totalorder %v3339_v63, %v4426_v14  ;;  %vm685_vm12 = vcmp.eq.s32.totalorder %v3339_v63, %v4427_v22  ;;  %vm2643_vm5 = vmpackc.low %vm692_vm2, %vm690_vm1  ;;  %v4433_v14 = vld [vmem:[#allocation57_spill] sm:$0xff]  ;;  %v4434_v22 = vld [vmem:[#allocation58_spill] sm:$0xff] }
 0x148   : > { %2636 = vmatprep.subr.msk.bf16.mxu1 %vm2635_vm13, %v4404_v3  ;;  %vm687_vm13 = vcmp.eq.s32.totalorder %v3339_v63, %v4428_v23  ;;  %vm2577_vm0 = vmpackc.low %vm623_vm11, %vm621_vm10  ;;  %vm630_vm10 = vcmp.eq.s32.totalorder %v3337_v0, %v4433_v14  ;;  %vm632_vm11 = vcmp.eq.s32.totalorder %v3337_v0, %v4434_v22  ;;  %v4435_v23 = vld [vmem:[#allocation89_spill] sm:$0xff]  ;;  %vm629_vm2 = vcmp.eq.s32.totalorder %v3339_v63, %v4433_v14  ;;  %v4440_v14 = vld [vmem:[#allocation92_spill] sm:$0xff] }
 0x149   : > { %vm2641_vm3 = vmpackc.low %vm687_vm13, %vm685_vm12  ;;  %vm694_vm13 = vcmp.eq.s32.totalorder %v3337_v0, %v4435_v23 }
 0x14e   : > { %2574 = vmatpush1.bf16.xpose.msk.msra.mxu0 %vm2573_vm4, %v4404_v3  ;;  %vm2579_vm4 = vmpackc.low %vm628_vm15, %vm626_vm14  ;;  %vm696_vm14 = vcmp.eq.s32.totalorder %v3337_v0, %v4436_v5 }
 0x14f   : > { %2638 = vmatpush1.bf16.xpose.msk.msra.mxu1 %vm2637_vm7, %v4404_v3  ;;  %2576 = vmatprep.subr.msk.bf16.mxu0 %vm2575_vm8, %v4404_v3  ;;  %vm627_vm7 = vcmp.eq.s32.totalorder %v3339_v63, %v4430_v18  ;;  %vm689_vm8 = vcmp.eq.s32.totalorder %v3339_v63, %v4431_v21  ;;  %vm2647_vm1 = vmpackc.low %vm696_vm14, %vm694_vm13  ;;  %v4438_v18 = vld [vmem:[#allocation60_spill] sm:$0xff]  ;;  %v4439_v21 = vld [vmem:[#allocation91_spill] sm:$0xff] }
 0x150   : > { %2640 = vmatprep.subr.msk.bf16.mxu1 %vm2639_vm9, %v4404_v3  ;;  %vm691_vm9 = vcmp.eq.s32.totalorder %v3339_v63, %v4432_v9  ;;  %vm2581_vm12 = vmpackc.low %vm627_vm7, %vm625_vm6  ;;  %v4437_v9 = vld [vmem:[#allocation59_spill] sm:$0xff]  ;;  %vm636_vm7 = vcmp.eq.s32.totalorder %v3337_v0, %v4438_v18 }
 0x151   : > { %vm2645_vm15 = vmpackc.low %vm691_vm9, %vm689_vm8  ;;  %vm634_vm6 = vcmp.eq.s32.totalorder %v3337_v0, %v4437_v9  ;;  %vm698_vm9 = vcmp.eq.s32.totalorder %v3337_v0, %v4439_v21  ;;  %vm633_vm14 = vcmp.eq.s32.totalorder %v3339_v63, %v4437_v9  ;;  %v4444_v9 = vld [vmem:[#allocation94_spill] sm:$0xff] }
 0x156   : > { %2578 = vmatpush1.bf16.xpose.msk.msra.mxu0 %vm2577_vm0, %v4404_v3  ;;  %vm2583_vm0 = vmpackc.low %vm632_vm11, %vm630_vm10  ;;  %vm700_vm10 = vcmp.eq.s32.totalorder %v3337_v0, %v4440_v14 }
 0x157   : > { %2642 = vmatpush1.bf16.xpose.msk.msra.mxu1 %vm2641_vm3, %v4404_v3  ;;  %2580 = vmatprep.subr.msk.bf16.mxu0 %vm2579_vm4, %v4404_v3  ;;  %vm631_vm3 = vcmp.eq.s32.totalorder %v3339_v63, %v4434_v22  ;;  %vm693_vm4 = vcmp.eq.s32.totalorder %v3339_v63, %v4435_v23  ;;  %vm2651_vm13 = vmpackc.low %vm700_vm10, %vm698_vm9  ;;  %v4442_v22 = vld [vmem:[#allocation62_spill] sm:$0xff]  ;;  %v4443_v23 = vld [vmem:[#allocation93_spill] sm:$0xff] }
 0x158   : > { %2644 = vmatprep.subr.msk.bf16.mxu1 %vm2643_vm5, %v4404_v3  ;;  %vm695_vm5 = vcmp.eq.s32.totalorder %v3339_v63, %v4436_v5  ;;  %vm2585_vm8 = vmpackc.low %vm631_vm3, %vm629_vm2  ;;  %v4441_v5 = vld [vmem:[#allocation61_spill] sm:$0xff]  ;;  %vm640_vm3 = vcmp.eq.s32.totalorder %v3337_v0, %v4442_v22 }
 0x159   : > { %vm2649_vm11 = vmpackc.low %vm695_vm5, %vm693_vm4  ;;  %vm638_vm2 = vcmp.eq.s32.totalorder %v3337_v0, %v4441_v5  ;;  %vm702_vm5 = vcmp.eq.s32.totalorder %v3337_v0, %v4443_v23  ;;  %vm637_vm10 = vcmp.eq.s32.totalorder %v3339_v63, %v4441_v5  ;;  %v4448_v5 = vld [vmem:[#allocation65_spill] sm:$0xff] }
 0x15e   : > { %2582 = vmatpush1.bf16.xpose.msk.msra.mxu0 %vm2581_vm12, %v4404_v3  ;;  %vm2587_vm12 = vmpackc.low %vm636_vm7, %vm634_vm6  ;;  %vm704_vm6 = vcmp.eq.s32.totalorder %v3337_v0, %v4444_v9 }
 0x15f   : > { %2646 = vmatpush1.bf16.xpose.msk.msra.mxu1 %vm2645_vm15, %v4404_v3  ;;  %2584 = vmatprep.subr.msk.bf16.mxu0 %vm2583_vm0, %v4404_v3  ;;  %vm635_vm15 = vcmp.eq.s32.totalorder %v3339_v63, %v4438_v18  ;;  %vm697_vm0 = vcmp.eq.s32.totalorder %v3339_v63, %v4439_v21  ;;  %vm2655_vm9 = vmpackc.low %vm704_vm6, %vm702_vm5  ;;  %v4446_v18 = vld [vmem:[#allocation64_spill] sm:$0xff]  ;;  %v4447_v21 = vld [vmem:[#allocation95_spill] sm:$0xff] }
 0x160   : > { %2648 = vmatprep.subr.msk.bf16.mxu1 %vm2647_vm1, %v4404_v3  ;;  %vm699_vm1 = vcmp.eq.s32.totalorder %v3339_v63, %v4440_v14  ;;  %vm2589_vm4 = vmpackc.low %vm635_vm15, %vm633_vm14  ;;  %v4445_v14 = vld [vmem:[#allocation63_spill] sm:$0xff]  ;;  %vm644_vm15 = vcmp.eq.s32.totalorder %v3337_v0, %v4446_v18 }
 0x161   : > { %vm2653_vm7 = vmpackc.low %vm699_vm1, %vm697_vm0  ;;  %vm642_vm14 = vcmp.eq.s32.totalorder %v3337_v0, %v4445_v14  ;;  %vm706_vm1 = vcmp.eq.s32.totalorder %v3337_v0, %v4447_v21  ;;  %vm641_vm6 = vcmp.eq.s32.totalorder %v3339_v63, %v4445_v14  ;;  %v4451_v14 = vld [vmem:[#allocation97_spill] sm:$0xff] }
 0x166   : > { %2586 = vmatpush1.bf16.xpose.msk.msra.mxu0 %vm2585_vm8, %v4404_v3  ;;  %vm2591_vm8 = vmpackc.low %vm640_vm3, %vm638_vm2  ;;  %vm708_vm2 = vcmp.eq.s32.totalorder %v3337_v0, %v3301_v33 }
 0x167   : > { %2650 = vmatpush1.bf16.xpose.msk.msra.mxu1 %vm2649_vm11, %v4404_v3  ;;  %2588 = vmatprep.subr.msk.bf16.mxu0 %vm2587_vm12, %v4404_v3  ;;  %vm639_vm11 = vcmp.eq.s32.totalorder %v3339_v63, %v4442_v22  ;;  %vm701_vm12 = vcmp.eq.s32.totalorder %v3339_v63, %v4443_v23  ;;  %vm2659_vm5 = vmpackc.low %vm708_vm2, %vm706_vm1  ;;  %v4450_v22 = vld [vmem:[#allocation96_spill] sm:$0xff]  ;;  %vm645_vm2 = vcmp.eq.s32.totalorder %v3339_v63, %v4448_v5  ;;  %v4454_v23 = vld [vmem:[#allocation98_spill] sm:$0xff] }
 0x168   : > { %2652 = vmatprep.subr.msk.bf16.mxu1 %vm2651_vm13, %v4404_v3  ;;  %vm703_vm13 = vcmp.eq.s32.totalorder %v3339_v63, %v4444_v9  ;;  %vm2593_vm0 = vmpackc.low %vm639_vm11, %vm637_vm10  ;;  %vm646_vm10 = vcmp.eq.s32.totalorder %v3337_v0, %v4448_v5  ;;  %v4449_v9 = vld [vmem:[#allocation66_spill] sm:$0xff]  ;;  %v4455_v5 = vld [vmem:[#allocation99_spill] sm:$0xff] }
 0x169   : > { %vm2657_vm3 = vmpackc.low %vm703_vm13, %vm701_vm12  ;;  %vm648_vm11 = vcmp.eq.s32.totalorder %v3337_v0, %v4449_v9  ;;  %vm710_vm13 = vcmp.eq.s32.totalorder %v3337_v0, %v4450_v22 }
 0x16e   : > { %2590 = vmatpush1.bf16.xpose.msk.msra.mxu0 %vm2589_vm4, %v4404_v3  ;;  %vm2595_vm4 = vmpackc.low %vm644_vm15, %vm642_vm14  ;;  %vm712_vm14 = vcmp.eq.s32.totalorder %v3337_v0, %v4451_v14 }
 0x16f   : > { %2654 = vmatpush1.bf16.xpose.msk.msra.mxu1 %vm2653_vm7, %v4404_v3  ;;  %2592 = vmatprep.subr.msk.bf16.mxu0 %vm2591_vm8, %v4404_v3  ;;  %vm643_vm7 = vcmp.eq.s32.totalorder %v3339_v63, %v4446_v18  ;;  %vm705_vm8 = vcmp.eq.s32.totalorder %v3339_v63, %v4447_v21  ;;  %vm2663_vm1 = vmpackc.low %vm712_vm14, %vm710_vm13  ;;  %v4452_v18 = vld [vmem:[#allocation67_spill] sm:$0xff]  ;;  %v4453_v21 = vld [vmem:[#allocation68_spill] sm:$0xff] }
 0x170   : > { %2656 = vmatprep.subr.msk.bf16.mxu1 %vm2655_vm9, %v4404_v3  ;;  %vm707_vm9 = vcmp.eq.s32.totalorder %v3339_v63, %v3301_v33  ;;  %vm2597_vm12 = vmpackc.low %vm643_vm7, %vm641_vm6  ;;  %vm650_vm6 = vcmp.eq.s32.totalorder %v3337_v0, %v4452_v18  ;;  %vm652_vm7 = vcmp.eq.s32.totalorder %v3337_v0, %v4453_v21  ;;  %vm649_vm14 = vcmp.eq.s32.totalorder %v3339_v63, %v4452_v18  ;;  %v4459_v18 = vld [vmem:[#allocation101_spill] sm:$0xff] }
 0x171   : > { %vm2661_vm15 = vmpackc.low %vm707_vm9, %vm705_vm8  ;;  %vm714_vm9 = vcmp.eq.s32.totalorder %v3337_v0, %v4454_v23 }
 0x176   : > { %2594 = vmatpush1.bf16.xpose.msk.msra.mxu0 %vm2593_vm0, %v4404_v3  ;;  %vm2599_vm0 = vmpackc.low %vm648_vm11, %vm646_vm10  ;;  %vm716_vm10 = vcmp.eq.s32.totalorder %v3337_v0, %v4455_v5 }
 0x177   : > { %2658 = vmatpush1.bf16.xpose.msk.msra.mxu1 %vm2657_vm3, %v4404_v3  ;;  %2596 = vmatprep.subr.msk.bf16.mxu0 %vm2595_vm4, %v4404_v3  ;;  %vm647_vm3 = vcmp.eq.s32.totalorder %v3339_v63, %v4449_v9  ;;  %vm709_vm4 = vcmp.eq.s32.totalorder %v3339_v63, %v4450_v22  ;;  %vm2667_vm13 = vmpackc.low %vm716_vm10, %vm714_vm9  ;;  %v4456_v9 = vld [vmem:[#allocation69_spill] sm:$0xff]  ;;  %v4458_v22 = vld [vmem:[#allocation100_spill] sm:$0xff] }
 0x178   : > { %2660 = vmatprep.subr.msk.bf16.mxu1 %vm2659_vm5, %v4404_v3  ;;  %vm711_vm5 = vcmp.eq.s32.totalorder %v3339_v63, %v4451_v14  ;;  %vm2601_vm8 = vmpackc.low %vm647_vm3, %vm645_vm2  ;;  %vm654_vm2 = vcmp.eq.s32.totalorder %v3337_v0, %v4456_v9  ;;  %v4457_v14 = vld [vmem:[#allocation70_spill] sm:$0xff]  ;;  %vm653_vm10 = vcmp.eq.s32.totalorder %v3339_v63, %v4456_v9 }
 0x179   : > { %vm2665_vm11 = vmpackc.low %vm711_vm5, %vm709_vm4  ;;  %vm656_vm3 = vcmp.eq.s32.totalorder %v3337_v0, %v4457_v14  ;;  %vm718_vm5 = vcmp.eq.s32.totalorder %v3337_v0, %v4458_v22 }
 0x17e   : > { %2598 = vmatpush1.bf16.xpose.msk.msra.mxu0 %vm2597_vm12, %v4404_v3  ;;  %vm2603_vm12 = vmpackc.low %vm652_vm7, %vm650_vm6  ;;  %vm720_vm6 = vcmp.eq.s32.totalorder %v3337_v0, %v4459_v18  ;;  %v1243_v0 = vld [vmem:[#allocation8 + $0x50] sm:$0xff] }
 0x17f   : > { %2662 = vmatpush1.bf16.xpose.msk.msra.mxu1 %vm2661_vm15, %v4404_v3  ;;  %2600 = vmatprep.subr.msk.bf16.mxu0 %vm2599_vm0, %v4404_v3  ;;  %vm651_vm15 = vcmp.eq.s32.totalorder %v3339_v63, %v4453_v21  ;;  %vm713_vm0 = vcmp.eq.s32.totalorder %v3339_v63, %v4454_v23  ;;  %vm2671_vm9 = vmpackc.low %vm720_vm6, %vm718_vm5 }
 0x180   : > { %2664 = vmatprep.subr.msk.bf16.mxu1 %vm2663_vm1, %v4404_v3  ;;  %vm715_vm1 = vcmp.eq.s32.totalorder %v3339_v63, %v4455_v5  ;;  %vm2605_vm4 = vmpackc.low %vm651_vm15, %vm649_vm14 }
 0x181   : > { %vm2669_vm7 = vmpackc.low %vm715_vm1, %vm713_vm0 }
 0x186   : > { %2602 = vmatpush1.bf16.xpose.msk.msra.mxu0 %vm2601_vm8, %v4404_v3  ;;  %vm2607_vm8 = vmpackc.low %vm656_vm3, %vm654_vm2 }
 0x187   : > { %2666 = vmatpush1.bf16.xpose.msk.msra.mxu1 %vm2665_vm11, %v4404_v3  ;;  %2604 = vmatprep.subr.msk.bf16.mxu0 %vm2603_vm12, %v4404_v3  ;;  %vm655_vm11 = vcmp.eq.s32.totalorder %v3339_v63, %v4457_v14  ;;  %vm717_vm12 = vcmp.eq.s32.totalorder %v3339_v63, %v4458_v22 }
 0x188   : > { %2668 = vmatprep.subr.msk.bf16.mxu1 %vm2667_vm13, %v4404_v3  ;;  %vm719_vm13 = vcmp.eq.s32.totalorder %v3339_v63, %v4459_v18  ;;  %vm2609_vm14 = vmpackc.low %vm655_vm11, %vm653_vm10  ;;  %v1249_v18 = vld [vmem:[#allocation8 + $0x80] sm:$0xff] }
 0x189   : > { %vm2673_vm15 = vmpackc.low %vm719_vm13, %vm717_vm12 }
 0x18e   : > { %2606 = vmatpush1.bf16.xpose.msk.msra.mxu0 %vm2605_vm4, %v4404_v3 }
 0x18f   : > { %2670 = vmatpush1.bf16.xpose.msk.msra.mxu1 %vm2669_vm7, %v4404_v3  ;;  %2608 = vmatprep.subr.msk.bf16.mxu0 %vm2607_vm8, %v4404_v3 }
 0x190   : > { %2672 = vmatprep.subr.msk.bf16.mxu1 %vm2671_vm9, %v4404_v3 }
 0x196   : > { %2610 = vmatpush1.bf16.xpose.msk.msra.mxu0 %vm2609_vm14, %v4404_v3 }
 0x197   : > { %2674 = vmatpush1.bf16.xpose.msk.msra.mxu1 %vm2673_vm15, %v4404_v3  ;;  %v1233_v3 = vld [vmem:[#allocation8] sm:$0xff] }
 0x19d   : > { %1588 = vmatmul.mubr.f32.vlgmr.msra.gmra.mrb[16].mxu0 %v3691_v7 }
 0x19e   : > { %1701 = vmatmul.mubr.f32.vlgmr.msra.gmra.mrb[16].mxu1 %v3691_v7  ;;  %1593 = vmatprep.mubr.f32.mxu0 %v3699_v2  ;;  %v1234_v7 = vld [vmem:[#allocation8 + $0x8] sm:$0xff] }
 0x19f   : > { %1706 = vmatprep.mubr.f32.mxu1 %v3699_v2 }
 0x1a1   : > { %1594 = vmatmul.mubr.f32.gmra.mrb[18].mxu0 %v3704_v4 }
 0x1a2   : > { %1707 = vmatmul.mubr.f32.gmra.mrb[18].mxu1 %v3704_v4  ;;  %1599 = vmatprep.mubr.f32.mxu0 %v3713_v8  ;;  %v1235_v4 = vld [vmem:[#allocation8 + $0x10] sm:$0xff] }
 0x1a3   : > { %1712 = vmatprep.mubr.f32.mxu1 %v3713_v8 }
 0x1a5   : > { %1600 = vmatmul.mubr.f32.gmra.mrb[20].mxu0 %v3734_v10 }
 0x1a6   : > { %1713 = vmatmul.mubr.f32.gmra.mrb[20].mxu1 %v3734_v10  ;;  %1605 = vmatprep.mubr.f32.mxu0 %v3739_v11  ;;  %v1236_v10 = vld [vmem:[#allocation8 + $0x18] sm:$0xff] }
 0x1a7   : > { %1718 = vmatprep.mubr.f32.mxu1 %v3739_v11 }
 0x1a9   : > { %1606 = vmatmul.mubr.f32.gmra.mrb[22].mxu0 %v3744_v12 }
 0x1aa   : > { %1719 = vmatmul.mubr.f32.gmra.mrb[22].mxu1 %v3744_v12  ;;  %1611 = vmatprep.mubr.f32.mxu0 %v3753_v13 }
 0x1ab   : > { %1724 = vmatprep.mubr.f32.mxu1 %v3753_v13 }
 0x1ad   : > { %1612 = vmatmul.mubr.f32.gmra.mrb[24].mxu0 %v3774_v1 }
 0x1ae   : > { %1725 = vmatmul.mubr.f32.gmra.mrb[24].mxu1 %v3774_v1  ;;  %1617 = vmatprep.mubr.f32.mxu0 %v3779_v15 }
 0x1af   : > { %1730 = vmatprep.mubr.f32.mxu1 %v3779_v15 }
 0x1b1   : > { %1618 = vmatmul.mubr.f32.gmra.mrb[26].mxu0 %v3784_v16 }
 0x1b2   : > { %1731 = vmatmul.mubr.f32.gmra.mrb[26].mxu1 %v3784_v16  ;;  %1623 = vmatprep.mubr.f32.mxu0 %v3793_v17 }
 0x1b3   : > { %1736 = vmatprep.mubr.f32.mxu1 %v3793_v17 }
 0x1b5   : > { %1624 = vmatmul.mubr.f32.gmra.mrb[28].mxu0 %v3814_v6 }
 0x1b6   : > { %1737 = vmatmul.mubr.f32.gmra.mrb[28].mxu1 %v3814_v6  ;;  %1629 = vmatprep.mubr.f32.mxu0 %v3819_v19  ;;  %v1241_v6 = vld [vmem:[#allocation8 + $0x40] sm:$0xff] }
 0x1b7   : > { %1742 = vmatprep.mubr.f32.mxu1 %v3819_v19  ;;  %v1242_v19 = vld [vmem:[#allocation8 + $0x48] sm:$0xff] }
 0x1b9   : > { %1630 = vmatmul.mubr.f32.gmra.mrb[30].mxu0 %v3824_v20 }
 0x1ba   : > { %1743 = vmatmul.mubr.f32.gmra.mrb[30].mxu1 %v3824_v20  ;;  %v1244_v20 = vld [vmem:[#allocation8 + $0x58] sm:$0xff] }
 0x1f0   : > { %v1363_v8 = vpop.f32.mrb[0].mxu0 }
 0x1f1   : > { %v1749_v11 = vadd.f32 %v1363_v8, %v1233_v3  ;;  %v1476_v12 = vpop.f32.mrb[0].mxu1  ;;  %v1365_v13 = vpop.f32.mrb[1].mxu0 }
 0x1f2   : > { %v1751_v15 = vadd.f32 %v1476_v12, %v1235_v4  ;;  %v1750_v16 = vadd.f32 %v1365_v13, %v1234_v7  ;;  %v1478_v17 = vpop.f32.mrb[1].mxu1  ;;  %v1251_v7 = vld [vmem:[#allocation8 + $0x90] sm:$0xff]  ;;  %v1250_v12 = vld [vmem:[#allocation8 + $0x88] sm:$0xff] }
 0x1f3   : > { %1813 = vst [vmem:[#allocation8] sm:$0xff] %v1749_v11  ;;  %v1752_v63 = vadd.f32 %v1478_v17, %v1236_v10  ;;  %v1252_v11 = vld [vmem:[#allocation8 + $0x98] sm:$0xff] }
 0x1f4   : > { %1815 = vst [vmem:[#allocation8 + $0x10] sm:$0xff] %v1751_v15  ;;  %1814 = vst [vmem:[#allocation8 + $0x8] sm:$0xff] %v1750_v16  ;;  %v1369_v1 = vpop.f32.mrb[2].mxu0 }
 0x1f5   : > { %1816 = vst [vmem:[#allocation8 + $0x18] sm:$0xff] %v1752_v63  ;;  %v1757_v2 = vadd.f32 %v1369_v1, %v1241_v6  ;;  %v1482_v5 = vpop.f32.mrb[2].mxu1  ;;  %v1371_v9 = vpop.f32.mrb[3].mxu0  ;;  %v1257_v1 = vld [vmem:[#allocation8 + $0xc0] sm:$0xff] }
 0x1f6   : > { %v1759_v14 = vadd.f32 %v1482_v5, %v1243_v0  ;;  %v1758_v3 = vadd.f32 %v1371_v9, %v1242_v19  ;;  %v1484_v8 = vpop.f32.mrb[3].mxu1  ;;  %v1259_v9 = vld [vmem:[#allocation8 + $0xd0] sm:$0xff]  ;;  %v1258_v0 = vld [vmem:[#allocation8 + $0xc8] sm:$0xff] }
 0x1f7   : > { %1821 = vst [vmem:[#allocation8 + $0x40] sm:$0xff] %v1757_v2  ;;  %v1760_v4 = vadd.f32 %v1484_v8, %v1244_v20  ;;  %v1260_v20 = vld [vmem:[#allocation8 + $0xd8] sm:$0xff] }
 0x1f8   : > { %1823 = vst [vmem:[#allocation8 + $0x50] sm:$0xff] %v1759_v14  ;;  %1822 = vst [vmem:[#allocation8 + $0x48] sm:$0xff] %v1758_v3  ;;  %v1375_v10 = vpop.f32.mrb[4].mxu0 }
 0x1f9   : > { %1824 = vst [vmem:[#allocation8 + $0x58] sm:$0xff] %v1760_v4  ;;  %v1765_v13 = vadd.f32 %v1375_v10, %v1249_v18  ;;  %v1488_v15 = vpop.f32.mrb[4].mxu1  ;;  %v1377_v16 = vpop.f32.mrb[5].mxu0  ;;  %v1265_v10 = vld [vmem:[#allocation8 + $0x100] sm:$0xff] }
 0x1fa   : > { %v1767_v17 = vadd.f32 %v1488_v15, %v1251_v7  ;;  %v1766_v6 = vadd.f32 %v1377_v16, %v1250_v12  ;;  %v1490_v63 = vpop.f32.mrb[5].mxu1  ;;  %v1267_v12 = vld [vmem:[#allocation8 + $0x110] sm:$0xff]  ;;  %v1266_v15 = vld [vmem:[#allocation8 + $0x108] sm:$0xff] }
 0x1fb   : > { %1829 = vst [vmem:[#allocation8 + $0x80] sm:$0xff] %v1765_v13  ;;  %v1768_v5 = vadd.f32 %v1490_v63, %v1252_v11  ;;  %v1268_v13 = vld [vmem:[#allocation8 + $0x118] sm:$0xff] }
 0x1fc   : > { %1831 = vst [vmem:[#allocation8 + $0x90] sm:$0xff] %v1767_v17  ;;  %1830 = vst [vmem:[#allocation8 + $0x88] sm:$0xff] %v1766_v6  ;;  %v1381_v19 = vpop.f32.mrb[6].mxu0 }
 0x1fd   : > { %1832 = vst [vmem:[#allocation8 + $0x98] sm:$0xff] %v1768_v5  ;;  %v1773_v14 = vadd.f32 %v1381_v19, %v1257_v1  ;;  %v1494_v2 = vpop.f32.mrb[6].mxu1  ;;  %v1383_v3 = vpop.f32.mrb[7].mxu0  ;;  %v1273_v19 = vld [vmem:[#allocation8 + $0x140] sm:$0xff] }
 0x1fe   : > { %v1775_v8 = vadd.f32 %v1494_v2, %v1259_v9  ;;  %v1774_v18 = vadd.f32 %v1383_v3, %v1258_v0  ;;  %v1496_v4 = vpop.f32.mrb[7].mxu1  ;;  %v1275_v0 = vld [vmem:[#allocation8 + $0x150] sm:$0xff]  ;;  %v1274_v2 = vld [vmem:[#allocation8 + $0x148] sm:$0xff] }
 0x1ff   : > { %1837 = vst [vmem:[#allocation8 + $0xc0] sm:$0xff] %v1773_v14  ;;  %v1776_v7 = vadd.f32 %v1496_v4, %v1260_v20  ;;  %v1276_v14 = vld [vmem:[#allocation8 + $0x158] sm:$0xff] }
 0x200   : > { %1839 = vst [vmem:[#allocation8 + $0xd0] sm:$0xff] %v1775_v8  ;;  %1838 = vst [vmem:[#allocation8 + $0xc8] sm:$0xff] %v1774_v18  ;;  %v1387_v11 = vpop.f32.mrb[8].mxu0 }
 0x201   : > { %1840 = vst [vmem:[#allocation8 + $0xd8] sm:$0xff] %v1776_v7  ;;  %v1781_v16 = vadd.f32 %v1387_v11, %v1265_v10  ;;  %v1500_v17 = vpop.f32.mrb[8].mxu1  ;;  %v1389_v6 = vpop.f32.mrb[9].mxu0  ;;  %v1281_v11 = vld [vmem:[#allocation8 + $0x180] sm:$0xff] }
 0x202   : > { %v1783_v63 = vadd.f32 %v1500_v17, %v1267_v12  ;;  %v1782_v1 = vadd.f32 %v1389_v6, %v1266_v15  ;;  %v1502_v5 = vpop.f32.mrb[9].mxu1  ;;  %v1283_v15 = vld [vmem:[#allocation8 + $0x190] sm:$0xff]  ;;  %v1282_v17 = vld [vmem:[#allocation8 + $0x188] sm:$0xff] }
 0x203   : > { %1845 = vst [vmem:[#allocation8 + $0x100] sm:$0xff] %v1781_v16  ;;  %v1784_v9 = vadd.f32 %v1502_v5, %v1268_v13  ;;  %v1284_v16 = vld [vmem:[#allocation8 + $0x198] sm:$0xff] }
 0x204   : > { %1847 = vst [vmem:[#allocation8 + $0x110] sm:$0xff] %v1783_v63  ;;  %1846 = vst [vmem:[#allocation8 + $0x108] sm:$0xff] %v1782_v1  ;;  %v1393_v20 = vpop.f32.mrb[10].mxu0 }
 0x205   : > { %1848 = vst [vmem:[#allocation8 + $0x118] sm:$0xff] %v1784_v9  ;;  %v1789_v3 = vadd.f32 %v1393_v20, %v1273_v19  ;;  %v1506_v8 = vpop.f32.mrb[10].mxu1  ;;  %v1395_v18 = vpop.f32.mrb[11].mxu0  ;;  %v1289_v20 = vld [vmem:[#allocation8 + $0x1c0] sm:$0xff] }
 0x206   : > { %v1791_v4 = vadd.f32 %v1506_v8, %v1275_v0  ;;  %v1790_v10 = vadd.f32 %v1395_v18, %v1274_v2  ;;  %v1508_v7 = vpop.f32.mrb[11].mxu1  ;;  %v1291_v2 = vld [vmem:[#allocation8 + $0x1d0] sm:$0xff]  ;;  %v1290_v8 = vld [vmem:[#allocation8 + $0x1c8] sm:$0xff] }
 0x207   : > { %1853 = vst [vmem:[#allocation8 + $0x140] sm:$0xff] %v1789_v3  ;;  %v1792_v12 = vadd.f32 %v1508_v7, %v1276_v14  ;;  %v1292_v3 = vld [vmem:[#allocation8 + $0x1d8] sm:$0xff] }
 0x208   : > { %1855 = vst [vmem:[#allocation8 + $0x150] sm:$0xff] %v1791_v4  ;;  %1854 = vst [vmem:[#allocation8 + $0x148] sm:$0xff] %v1790_v10  ;;  %v1399_v13 = vpop.f32.mrb[12].mxu0 }
 0x209   : > { %1856 = vst [vmem:[#allocation8 + $0x158] sm:$0xff] %v1792_v12  ;;  %v1797_v6 = vadd.f32 %v1399_v13, %v1281_v11  ;;  %v1512_v63 = vpop.f32.mrb[12].mxu1  ;;  %v1401_v1 = vpop.f32.mrb[13].mxu0  ;;  %v1239_v13 = vld [vmem:[#allocation8 + $0x30] sm:$0xff] }
 0x20a   : > { %v1799_v5 = vadd.f32 %v1512_v63, %v1283_v15  ;;  %v1798_v19 = vadd.f32 %v1401_v1, %v1282_v17  ;;  %v1514_v9 = vpop.f32.mrb[13].mxu1  ;;  %v1237_v17 = vld [vmem:[#allocation8 + $0x20] sm:$0xff]  ;;  %v1240_v63 = vld [vmem:[#allocation8 + $0x38] sm:$0xff] }
 0x20b   : > { %1861 = vst [vmem:[#allocation8 + $0x180] sm:$0xff] %v1797_v6  ;;  %v1800_v0 = vadd.f32 %v1514_v9, %v1284_v16  ;;  %v1238_v16 = vld [vmem:[#allocation8 + $0x28] sm:$0xff] }
 0x20c   : > { %1863 = vst [vmem:[#allocation8 + $0x190] sm:$0xff] %v1799_v5  ;;  %1862 = vst [vmem:[#allocation8 + $0x188] sm:$0xff] %v1798_v19  ;;  %v1405_v14 = vpop.f32.mrb[14].mxu0 }
 0x20d   : > { %1864 = vst [vmem:[#allocation8 + $0x198] sm:$0xff] %v1800_v0  ;;  %v1805_v18 = vadd.f32 %v1405_v14, %v1289_v20  ;;  %v1518_v4 = vpop.f32.mrb[14].mxu1  ;;  %v1407_v10 = vpop.f32.mrb[15].mxu0  ;;  %v1245_v14 = vld [vmem:[#allocation8 + $0x60] sm:$0xff] }
 0x20e   : > { %v1807_v7 = vadd.f32 %v1518_v4, %v1291_v2  ;;  %v1806_v11 = vadd.f32 %v1407_v10, %v1290_v8  ;;  %v1520_v12 = vpop.f32.mrb[15].mxu1  ;;  %v1247_v8 = vld [vmem:[#allocation8 + $0x70] sm:$0xff]  ;;  %v1248_v4 = vld [vmem:[#allocation8 + $0x78] sm:$0xff] }
 0x20f   : > { %1869 = vst [vmem:[#allocation8 + $0x1c0] sm:$0xff] %v1805_v18  ;;  %v1808_v15 = vadd.f32 %v1520_v12, %v1292_v3  ;;  %v1246_v18 = vld [vmem:[#allocation8 + $0x68] sm:$0xff] }
 0x210   : > { %1871 = vst [vmem:[#allocation8 + $0x1d0] sm:$0xff] %v1807_v7  ;;  %1870 = vst [vmem:[#allocation8 + $0x1c8] sm:$0xff] %v1806_v11 }
 0x211   : > { %1872 = vst [vmem:[#allocation8 + $0x1d8] sm:$0xff] %v1808_v15 }
 0x270   : > { %v1589_v6 = vpop.f32.mrb[16].mxu0 }
 0x271   : > { %v1753_v1 = vadd.f32 %v1589_v6, %v1237_v17  ;;  %v1702_v5 = vpop.f32.mrb[16].mxu1  ;;  %v1591_v19 = vpop.f32.mrb[17].mxu0  ;;  %v1253_v6 = vld [vmem:[#allocation8 + $0xa0] sm:$0xff] }
 0x272   : > { %v1755_v9 = vadd.f32 %v1702_v5, %v1239_v13  ;;  %v1754_v20 = vadd.f32 %v1591_v19, %v1238_v16  ;;  %v1704_v0 = vpop.f32.mrb[17].mxu1  ;;  %v1255_v16 = vld [vmem:[#allocation8 + $0xb0] sm:$0xff]  ;;  %v1254_v5 = vld [vmem:[#allocation8 + $0xa8] sm:$0xff] }
 0x273   : > { %1817 = vst [vmem:[#allocation8 + $0x20] sm:$0xff] %v1753_v1  ;;  %v1756_v2 = vadd.f32 %v1704_v0, %v1240_v63  ;;  %v1256_v1 = vld [vmem:[#allocation8 + $0xb8] sm:$0xff] }
 0x274   : > { %1819 = vst [vmem:[#allocation8 + $0x30] sm:$0xff] %v1755_v9  ;;  %1818 = vst [vmem:[#allocation8 + $0x28] sm:$0xff] %v1754_v20  ;;  %v1595_v3 = vpop.f32.mrb[18].mxu0 }
 0x275   : > { %1820 = vst [vmem:[#allocation8 + $0x38] sm:$0xff] %v1756_v2  ;;  %v1761_v10 = vadd.f32 %v1595_v3, %v1245_v14  ;;  %v1708_v7 = vpop.f32.mrb[18].mxu1  ;;  %v1597_v11 = vpop.f32.mrb[19].mxu0  ;;  %v1261_v3 = vld [vmem:[#allocation8 + $0xe0] sm:$0xff] }
 0x276   : > { %v1763_v12 = vadd.f32 %v1708_v7, %v1247_v8  ;;  %v1762_v15 = vadd.f32 %v1597_v11, %v1246_v18  ;;  %v1710_v17 = vpop.f32.mrb[19].mxu1  ;;  %v1263_v18 = vld [vmem:[#allocation8 + $0xf0] sm:$0xff]  ;;  %v1262_v7 = vld [vmem:[#allocation8 + $0xe8] sm:$0xff] }
 0x277   : > { %1825 = vst [vmem:[#allocation8 + $0x60] sm:$0xff] %v1761_v10  ;;  %v1764_v13 = vadd.f32 %v1710_v17, %v1248_v4  ;;  %v1264_v10 = vld [vmem:[#allocation8 + $0xf8] sm:$0xff] }
 0x278   : > { %1827 = vst [vmem:[#allocation8 + $0x70] sm:$0xff] %v1763_v12  ;;  %1826 = vst [vmem:[#allocation8 + $0x68] sm:$0xff] %v1762_v15  ;;  %v1601_v63 = vpop.f32.mrb[20].mxu0 }
 0x279   : > { %1828 = vst [vmem:[#allocation8 + $0x78] sm:$0xff] %v1764_v13  ;;  %v1769_v19 = vadd.f32 %v1601_v63, %v1253_v6  ;;  %v1714_v9 = vpop.f32.mrb[20].mxu1  ;;  %v1603_v20 = vpop.f32.mrb[21].mxu0  ;;  %v1269_v63 = vld [vmem:[#allocation8 + $0x120] sm:$0xff] }
 0x27a   : > { %v1771_v0 = vadd.f32 %v1714_v9, %v1255_v16  ;;  %v1770_v14 = vadd.f32 %v1603_v20, %v1254_v5  ;;  %v1716_v2 = vpop.f32.mrb[21].mxu1  ;;  %v1271_v5 = vld [vmem:[#allocation8 + $0x130] sm:$0xff]  ;;  %v1270_v9 = vld [vmem:[#allocation8 + $0x128] sm:$0xff] }
 0x27b   : > { %1833 = vst [vmem:[#allocation8 + $0xa0] sm:$0xff] %v1769_v19  ;;  %v1772_v8 = vadd.f32 %v1716_v2, %v1256_v1  ;;  %v1272_v19 = vld [vmem:[#allocation8 + $0x138] sm:$0xff] }
 0x27c   : > { %1835 = vst [vmem:[#allocation8 + $0xb0] sm:$0xff] %v1771_v0  ;;  %1834 = vst [vmem:[#allocation8 + $0xa8] sm:$0xff] %v1770_v14  ;;  %v1607_v4 = vpop.f32.mrb[22].mxu0 }
 0x27d   : > { %1836 = vst [vmem:[#allocation8 + $0xb8] sm:$0xff] %v1772_v8  ;;  %v1777_v11 = vadd.f32 %v1607_v4, %v1261_v3  ;;  %v1720_v12 = vpop.f32.mrb[22].mxu1  ;;  %v1609_v15 = vpop.f32.mrb[23].mxu0  ;;  %v1277_v4 = vld [vmem:[#allocation8 + $0x160] sm:$0xff] }
 0x27e   : > { %v1779_v17 = vadd.f32 %v1720_v12, %v1263_v18  ;;  %v1778_v6 = vadd.f32 %v1609_v15, %v1262_v7  ;;  %v1722_v13 = vpop.f32.mrb[23].mxu1  ;;  %v1279_v7 = vld [vmem:[#allocation8 + $0x170] sm:$0xff]  ;;  %v1278_v12 = vld [vmem:[#allocation8 + $0x168] sm:$0xff] }
 0x27f   : > { %1841 = vst [vmem:[#allocation8 + $0xe0] sm:$0xff] %v1777_v11  ;;  %v1780_v16 = vadd.f32 %v1722_v13, %v1264_v10  ;;  %v1280_v11 = vld [vmem:[#allocation8 + $0x178] sm:$0xff] }
 0x280   : > { %1843 = vst [vmem:[#allocation8 + $0xf0] sm:$0xff] %v1779_v17  ;;  %1842 = vst [vmem:[#allocation8 + $0xe8] sm:$0xff] %v1778_v6  ;;  %v1613_v1 = vpop.f32.mrb[24].mxu0 }
 0x281   : > { %1844 = vst [vmem:[#allocation8 + $0xf8] sm:$0xff] %v1780_v16  ;;  %v1785_v20 = vadd.f32 %v1613_v1, %v1269_v63  ;;  %v1726_v0 = vpop.f32.mrb[24].mxu1  ;;  %v1615_v14 = vpop.f32.mrb[25].mxu0  ;;  %v1285_v1 = vld [vmem:[#allocation8 + $0x1a0] sm:$0xff] }
 0x282   : > { %v1787_v2 = vadd.f32 %v1726_v0, %v1271_v5  ;;  %v1786_v3 = vadd.f32 %v1615_v14, %v1270_v9  ;;  %v1728_v8 = vpop.f32.mrb[25].mxu1  ;;  %v1287_v9 = vld [vmem:[#allocation8 + $0x1b0] sm:$0xff]  ;;  %v1286_v0 = vld [vmem:[#allocation8 + $0x1a8] sm:$0xff] }
 0x283   : > { %1849 = vst [vmem:[#allocation8 + $0x120] sm:$0xff] %v1785_v20  ;;  %v1788_v18 = vadd.f32 %v1728_v8, %v1272_v19  ;;  %v1288_v20 = vld [vmem:[#allocation8 + $0x1b8] sm:$0xff] }
 0x284   : > { %1851 = vst [vmem:[#allocation8 + $0x130] sm:$0xff] %v1787_v2  ;;  %1850 = vst [vmem:[#allocation8 + $0x128] sm:$0xff] %v1786_v3  ;;  %v1619_v10 = vpop.f32.mrb[26].mxu0 }
 0x285   : > { %1852 = vst [vmem:[#allocation8 + $0x138] sm:$0xff] %v1788_v18  ;;  %v1793_v15 = vadd.f32 %v1619_v10, %v1277_v4  ;;  %v1732_v17 = vpop.f32.mrb[26].mxu1  ;;  %v1621_v6 = vpop.f32.mrb[27].mxu0  ;;  %v1293_v10 = vld [vmem:[#allocation8 + $0x1e0] sm:$0xff] }
 0x286   : > { %v1795_v13 = vadd.f32 %v1732_v17, %v1279_v7  ;;  %v1794_v63 = vadd.f32 %v1621_v6, %v1278_v12  ;;  %v1734_v16 = vpop.f32.mrb[27].mxu1  ;;  %v1295_v12 = vld [vmem:[#allocation8 + $0x1f0] sm:$0xff]  ;;  %v1294_v17 = vld [vmem:[#allocation8 + $0x1e8] sm:$0xff] }
 0x287   : > { %1857 = vst [vmem:[#allocation8 + $0x160] sm:$0xff] %v1793_v15  ;;  %v1796_v5 = vadd.f32 %v1734_v16, %v1280_v11  ;;  %v1296_v15 = vld [vmem:[#allocation8 + $0x1f8] sm:$0xff] }
 0x288   : > { %1859 = vst [vmem:[#allocation8 + $0x170] sm:$0xff] %v1795_v13  ;;  %1858 = vst [vmem:[#allocation8 + $0x168] sm:$0xff] %v1794_v63  ;;  %v1625_v19 = vpop.f32.mrb[28].mxu0 }
 0x289   : > { %1860 = vst [vmem:[#allocation8 + $0x178] sm:$0xff] %v1796_v5  ;;  %v1801_v14 = vadd.f32 %v1625_v19, %v1285_v1  ;;  %v1738_v2 = vpop.f32.mrb[28].mxu1  ;;  %v1627_v3 = vpop.f32.mrb[29].mxu0 }
 0x28a   : > { %v1803_v8 = vadd.f32 %v1738_v2, %v1287_v9  ;;  %v1802_v4 = vadd.f32 %v1627_v3, %v1286_v0  ;;  %v1740_v18 = vpop.f32.mrb[29].mxu1 }
 0x28b   : > { %1865 = vst [vmem:[#allocation8 + $0x1a0] sm:$0xff] %v1801_v14  ;;  %v1804_v7 = vadd.f32 %v1740_v18, %v1288_v20  ;;  %432 = sbr.rel (!%p429_p10) target bundleno = 143 (0x8f), region = 49 }
 0x28c   : > { %1867 = vst [vmem:[#allocation8 + $0x1b0] sm:$0xff] %v1803_v8  ;;  %1866 = vst [vmem:[#allocation8 + $0x1a8] sm:$0xff] %v1802_v4  ;;  %v1631_v11 = vpop.f32.mrb[30].mxu0 }
 0x28d   : > { %1868 = vst [vmem:[#allocation8 + $0x1b8] sm:$0xff] %v1804_v7  ;;  %v1809_v6 = vadd.f32 %v1631_v11, %v1293_v10  ;;  %v1744_v13 = vpop.f32.mrb[30].mxu1  ;;  %v1633_v63 = vpop.f32.mrb[31].mxu0 }
 0x28e   : > { %v1811_v16 = vadd.f32 %v1744_v13, %v1295_v12  ;;  %v1810_v1 = vadd.f32 %v1633_v63, %v1294_v17  ;;  %v1746_v5 = vpop.f32.mrb[31].mxu1 }
 0x28f   : > { %1873 = vst [vmem:[#allocation8 + $0x1e0] sm:$0xff] %v1809_v6  ;;  %v1812_v9 = vadd.f32 %v1746_v5, %v1296_v15 }
 0x290   : > { %1875 = vst [vmem:[#allocation8 + $0x1f0] sm:$0xff] %v1811_v16  ;;  %1874 = vst [vmem:[#allocation8 + $0x1e8] sm:$0xff] %v1810_v1 }
 0x291   : > { %1876 = vst [vmem:[#allocation8 + $0x1f8] sm:$0xff] %v1812_v9 }
 0x292 PF:  { %s2754_s23 = smov [#allocation8]  }
 0x293   :  { %s1882_s24 = sshll.u32 %s2754_s23, 4  ;;  %s1883_s24 = int_to_ptr.vmem [resolvable:$true] %s1882_s24 }
 0x294   :  { %s2714_s25 = scalar_lea.vmem %s1883_s24, 8192  ;;  %p2719_p12 = scmp.lt.s32.totalorder %s1883_s24, %s1883_s24 }
 0x295   :  { %p2715_p11 = scmp.ne.s32.totalorder %s1883_s24, %s2714_s25  ;;  %p2720_p13 = scmp.lt.s32.totalorder %s2714_s25, %s2714_s25 }
 0x297   :  { %p2721_p0 = por %p2720_p13, %p2719_p12 }
 0x299   :  { %p2722_p1 = pnand %p2721_p0, %p2715_p11 }
 0x29b   :  { %2725 = shalt.err (!%p2722_p1)
}
 0x29c   :  { %s2726_s27 = scalar_lea.hbm %s4117_s4, 8192 }
 0x29d   :  { %p2727_p2 = scmp.ne.s32.totalorder %s4117_s4, %s2726_s27  ;;  %p2730_p3 = scmp.lt.u32.totalorder %s2726_s27, %s4117_s4 }
 0x29f   :  { %p2732_p4 = pnand %p2730_p3, %p2727_p2 }
 0x2a1   :  { %2735 = shalt.err (!%p2732_p4)
}
 0x2a2   :  { %s2755_s30 = smov 1024   ;;  %s2756_s5 = smov 64  }
 0x2a3   :  { %1888 = dma.vmem_to_hbm [thread:$0]  %s1883_s24, 8192, %s4117_s4, [#allocation7], %s2755_s30, %s2755_s30, %s2756_s5  }
 0x2a4   :  { %2742 = dma.done.wait [#allocation7], 8192  }
 0x2a5   :  { %2743 = vsyncadd [#allocation7], 4294959104 }
 0x2a6   :  { %1892 = vsyncpa [#allocation6], 1 }
 0x2a7   :  { %1893 = vsyncpa [#allocation7], 1 }

</bundles_post_ra>
